<compile_context>
chip_gen: v7x
topology: tpu7x:2x2x1
jax: 0.10.0
libtpu: 0.0.40
codegen_flags: <defaults>
</compile_context>

<pallas_src>
import functools

import jax
import jax.numpy as jnp
from jax.experimental import pallas as pl
from jax.experimental.pallas import tpu as pltpu


def conv_bias_kernel(x_ref, coords_ref, w3_ref, b3_ref, gamma_ref, beta_ref,
                     gmat_ref, w1_ref, b1_ref, xbias_ref, xout_ref, colbuf_ref,
                     *, dims, pad, eps, merge_on_vpu):
    """One grid step == one batch element.  Layout: channels x DHW (spatial on lanes).

    x_ref     : (1, Cin, DHW)       raw input sample (flattened spatial)
    coords_ref: (2, DHW) int32      (h, w) coordinate of every flattened position
    w3_ref    : (Cout, KCp)         3x3x3 weight, column t*Cin+ci, t = kd*9+kh*3+kw
                                    (zero-padded from 27*Cin to KCp rows)
    b3_ref    : (Cout, 1)
    gamma_ref, beta_ref : (Cout, 1) GroupNorm affine
    gmat_ref  : (Cout, Cout)        group-average matrix, 1/(group_size*DHW) entries
    w1_ref    : (Cout, 1) [VPU path] or (bias_size, Cout) [matmul path]
    b1_ref    : (1, 1)    [VPU path] or (bias_size, 1)
    xbias_ref : (1, bias_size, DHW) output (merge conv)
    xout_ref  : (1, Cout, DHW)      output (gn+relu activation)
    colbuf_ref: (KCp, DHW + 2*pad)  VMEM scratch, implicit-im2col column buffer
    """
    D, H, W = dims
    DHW = D * H * W
    cin = x_ref.shape[1]

    xval = x_ref[0]                                               # (Cin, DHW)

    # ---- zero the column buffer (margins provide the d-edge zeros) ---------
    colbuf_ref[...] = jnp.zeros(colbuf_ref.shape, jnp.float32)

    # ---- input-side boundary masks (hoisted; h/w only, d handled by margins)
    ph = coords_ref[0:1, :]
    pw = coords_ref[1:2, :]
    h_lo = ph != (H - 1)      # kh == 0 taps read h-1: kill wrap source h == H-1
    h_hi = ph != 0            # kh == 2 taps read h+1: kill wrap source h == 0
    w_lo = pw != (W - 1)      # kw == 0
    w_hi = pw != 0            # kw == 2

    # ---- stage the implicit-im2col column buffer ----------------------------
    # Row block t holds the sample placed at columns [pad - off_t, pad - off_t + DHW)
    # so the single aligned window read colbuf[:, pad:pad+DHW] yields all 27
    # tap-shifted copies stacked along the contraction axis.
    for kh in range(3):
        for kw in range(3):
            parts = []
            if kh == 0:
                parts.append(h_lo)
            elif kh == 2:
                parts.append(h_hi)
            if kw == 0:
                parts.append(w_lo)
            elif kw == 2:
                parts.append(w_hi)
            if parts:
                m = parts[0]
                for extra in parts[1:]:
                    m = m & extra
                xm = jnp.where(m, xval, 0.0)
            else:
                xm = xval
            for kd in range(3):
                t = kd * 9 + kh * 3 + kw
                off = (kd - 1) * H * W + (kh - 1) * W + (kw - 1)
                c0 = pad - off
                colbuf_ref[t * cin:(t + 1) * cin, c0:c0 + DHW] = xm

    # ---- 3x3x3 conv: ONE implicit-GEMM matmul on the MXU --------------------
    col = colbuf_ref[:, pad:pad + DHW]                            # (KCp, DHW), aligned
    acc = jnp.dot(w3_ref[...], col, preferred_element_type=jnp.float32)
    acc = acc + b3_ref[...]                                       # (Cout, DHW)

    # ---- GroupNorm: two-pass (centered) variance over (group chans x DHW) ---
    ch_sum = jnp.sum(acc, axis=1, keepdims=True)                  # (Cout, 1)
    g_mean = jnp.dot(gmat_ref[...], ch_sum,
                     preferred_element_type=jnp.float32)          # (Cout, 1)
    centered = acc - g_mean
    ch_ss = jnp.sum(centered * centered, axis=1, keepdims=True)   # (Cout, 1)
    g_var = jnp.dot(gmat_ref[...], ch_ss,
                    preferred_element_type=jnp.float32)
    g_var = jnp.maximum(g_var, 0.0)                               # clamp: no NaN from rsqrt
    inv_std = jax.lax.rsqrt(g_var + eps)
    y = centered * inv_std * gamma_ref[...] + beta_ref[...]

    # ---- ReLU + lane-dense store --------------------------------------------
    y = jnp.maximum(y, 0.0)
    xout_ref[0] = y.astype(xout_ref.dtype)

    # ---- 1x1x1 "merge" conv --------------------------------------------------
    if merge_on_vpu:
        # bias_size == 1: weighted channel sum on VPU + sublane (XLU) reduce
        z = jnp.sum(y * w1_ref[...], axis=0, keepdims=True) + b1_ref[...]
    else:
        z = jnp.dot(w1_ref[...], y,
                    preferred_element_type=jnp.float32) + b1_ref[...]
    xbias_ref[0] = z.astype(xbias_ref.dtype)


def conv_bias_forward(x, params):
    """x: (N, Cin, D, H, W) float32, PyTorch NCDHW. Returns (x_bias, x_act) in NCDHW."""
    w_conv, b_conv, gamma, beta, w_merge, b_merge = params
    N, Cin, D, H, W = x.shape
    Cout = w_conv.shape[0]
    bias_size = w_merge.shape[0]
    assert w_conv.shape[1] == Cin, "conv weight / input channel mismatch"
    assert Cout % 4 == 0, "GroupNorm(out_ch // 4, out_ch) requires out_ch % 4 == 0"
    groups = Cout // 4
    group_size = Cout // groups
    DHW = D * H * W
    # flat zero margin on each side of the column buffer; must cover the
    # largest tap offset (H*W + W + 1); rounded up so the window read is lane-aligned.
    pad = ((H * W + W + 1 + 127) // 128) * 128
    KC = 27 * Cin
    KCp = ((KC + 7) // 8) * 8            # sublane-aligned contraction depth

    # ---- glue: free reshape to channel-major flattened-spatial layout ----
    xflat = x.reshape(N, Cin, DHW)

    # (h, w) coordinate of each flattened position (d not needed: handled by margins)
    hh, ww = jnp.meshgrid(jnp.arange(H, dtype=jnp.int32),
                          jnp.arange(W, dtype=jnp.int32), indexing="ij")
    hw = jnp.stack([hh.reshape(-1), ww.reshape(-1)], axis=0)      # (2, H*W)
    coords = jnp.tile(hw, (1, D))                                 # (2, DHW)

    # ---- glue: parameter reshapes (channels on sublanes) ----
    # (Cout, Cin, kd, kh, kw) -> (27*Cin, Cout), row t*Cin+ci with t = kd*9+kh*3+kw
    w3 = jnp.transpose(w_conv, (2, 3, 4, 1, 0)).reshape(KC, Cout)
    if KCp > KC:
        w3 = jnp.concatenate([w3, jnp.zeros((KCp - KC, Cout), w3.dtype)], axis=0)
    w3 = w3.T                                                     # (Cout, KCp)
    b3 = b_conv.reshape(Cout, 1)
    gamma2 = gamma.reshape(Cout, 1)
    beta2 = beta.reshape(Cout, 1)
    # group averaging matrix with 1/(group_size*DHW) normalization folded in
    gmat = (jnp.kron(jnp.eye(groups, dtype=jnp.float32),
                     jnp.ones((group_size, group_size), dtype=jnp.float32))
            / float(group_size * DHW))
    merge_on_vpu = (bias_size == 1)
    if merge_on_vpu:
        w1 = w_merge.reshape(bias_size, Cout).T        # (Cout, 1)
        b1 = b_merge.reshape(1, 1)
    else:
        w1 = w_merge.reshape(bias_size, Cout)          # (bias_size, Cout)
        b1 = b_merge.reshape(bias_size, 1)

    kernel = functools.partial(conv_bias_kernel, dims=(D, H, W), pad=pad,
                               eps=1e-5, merge_on_vpu=merge_on_vpu)

    x_bias_flat, x_out_flat = pl.pallas_call(
        kernel,
        out_shape=(
            jax.ShapeDtypeStruct((N, bias_size, DHW), x.dtype),
            jax.ShapeDtypeStruct((N, Cout, DHW), x.dtype),
        ),
        grid_spec=pltpu.PrefetchScalarGridSpec(
            num_scalar_prefetch=0,
            grid=(N,),
            in_specs=[
                pl.BlockSpec((1, Cin, DHW), lambda n: (n, 0, 0)),
                pl.BlockSpec((2, DHW), lambda n: (0, 0)),
                pl.BlockSpec((Cout, KCp), lambda n: (0, 0)),
                pl.BlockSpec((Cout, 1), lambda n: (0, 0)),
                pl.BlockSpec((Cout, 1), lambda n: (0, 0)),
                pl.BlockSpec((Cout, 1), lambda n: (0, 0)),
                pl.BlockSpec((Cout, Cout), lambda n: (0, 0)),
                pl.BlockSpec(w1.shape, lambda n: (0, 0)),
                pl.BlockSpec(b1.shape, lambda n: (0, 0)),
            ],
            out_specs=[
                pl.BlockSpec((1, bias_size, DHW), lambda n: (n, 0, 0)),
                pl.BlockSpec((1, Cout, DHW), lambda n: (n, 0, 0)),
            ],
            scratch_shapes=[pltpu.VMEM((KCp, DHW + 2 * pad), jnp.float32)],
        ),
        compiler_params=pltpu.CompilerParams(
            dimension_semantics=("parallel",),
        ),
    )(xflat, coords, w3, b3, gamma2, beta2, gmat, w1, b1)

    # ---- glue: outputs already channel-major -> free reshape to NCDHW ----
    x_bias = x_bias_flat.reshape(N, bias_size, D, H, W)
    x_act = x_out_flat.reshape(N, Cout, D, H, W)
    return x_bias, x_act


def ref_forward(x, params):
    """Pure-JAX reference matching the PyTorch module semantics (NCDHW)."""
    w_conv, b_conv, gamma, beta, w_merge, b_merge = params
    Cout = w_conv.shape[0]
    groups = Cout // 4
    y = jax.lax.conv_general_dilated(
        x, w_conv, window_strides=(1, 1, 1), padding=[(1, 1)] * 3,
        dimension_numbers=("NCDHW", "OIDHW", "NCDHW"))
    y = y + b_conv.reshape(1, Cout, 1, 1, 1)
    N, C, D, H, W = y.shape
    yg = y.reshape(N, groups, C // groups, D, H, W)
    mean = yg.mean(axis=(2, 3, 4, 5), keepdims=True)
    var = yg.var(axis=(2, 3, 4, 5), keepdims=True)
    yn = ((yg - mean) / jnp.sqrt(var + 1e-5)).reshape(N, C, D, H, W)
    yn = yn * gamma.reshape(1, C, 1, 1, 1) + beta.reshape(1, C, 1, 1, 1)
    yr = jnp.maximum(yn, 0.0)
    zb = jax.lax.conv_general_dilated(
        yr, w_merge, window_strides=(1, 1, 1), padding=[(0, 0)] * 3,
        dimension_numbers=("NCDHW", "OIDHW", "NCDHW"))
    zb = zb + b_merge.reshape(1, -1, 1, 1, 1)
    return zb, yr


if __name__ == "__main__":
    # Small shapes consistent with the module: in_ch=4, out_ch=8 (GroupNorm(2, 8)),
    # bias_size=1, batch=2, spatial volume 8x8x8 (DHW = 512, lane-dense).
    N, Cin, Cout, bias_size = 2, 4, 8, 1
    D = H = W = 8

    key = jax.random.PRNGKey(0)
    ks = jax.random.split(key, 7)
    x = jax.random.normal(ks[0], (N, Cin, D, H, W), dtype=jnp.float32)
    w_conv = 0.1 * jax.random.normal(ks[1], (Cout, Cin, 3, 3, 3), dtype=jnp.float32)
    b_conv = 0.1 * jax.random.normal(ks[2], (Cout,), dtype=jnp.float32)
    gamma = 1.0 + 0.1 * jax.random.normal(ks[3], (Cout,), dtype=jnp.float32)
    beta = 0.1 * jax.random.normal(ks[4], (Cout,), dtype=jnp.float32)
    w_merge = 0.1 * jax.random.normal(ks[5], (bias_size, Cout, 1, 1, 1), dtype=jnp.float32)
    b_merge = 0.1 * jax.random.normal(ks[6], (bias_size,), dtype=jnp.float32)
    params = (w_conv, b_conv, gamma, beta, w_merge, b_merge)

    fwd = jax.jit(functools.partial(conv_bias_forward))
    x_bias, x_act = fwd(x, params)
    jax.block_until_ready((x_bias, x_act))

    # sanity check against a pure-JAX reference of the PyTorch forward
    rb, ra = ref_forward(x, params)
    assert x_bias.shape == (N, bias_size, D, H, W) and x_act.shape == (N, Cout, D, H, W)
    assert jnp.allclose(x_act, ra, atol=1e-2, rtol=1e-2), "activation mismatch"
    assert jnp.allclose(x_bias, rb, atol=1e-2, rtol=1e-2), "bias output mismatch"

    print("KERNEL_OK")
</pallas_src>

<mosaic_0001>
module attributes {stable_mosaic.version = 11 : i64} {
  func.func @conv_bias_kernel(%arg0: i32, %arg1: memref<1x4x512xf32, #tpu.memory_space<vmem>>, %arg2: memref<2x512xi32, #tpu.memory_space<vmem>>, %arg3: memref<8x112xf32, #tpu.memory_space<vmem>>, %arg4: memref<8x1xf32, #tpu.memory_space<vmem>>, %arg5: memref<8x1xf32, #tpu.memory_space<vmem>>, %arg6: memref<8x1xf32, #tpu.memory_space<vmem>>, %arg7: memref<8x8xf32, #tpu.memory_space<vmem>>, %arg8: memref<8x1xf32, #tpu.memory_space<vmem>>, %arg9: memref<1x1xf32, #tpu.memory_space<vmem>>, %arg10: memref<1x1x512xf32, #tpu.memory_space<vmem>>, %arg11: memref<1x8x512xf32, #tpu.memory_space<vmem>>, %arg12: memref<112x768xf32, #tpu.memory_space<vmem>>) attributes {dimension_semantics = [#tpu.dimension_semantics<parallel>], iteration_bounds = array<i64: 2>, scalar_prefetch = 0 : i64, scratch_operands = 1 : i64, tpu.core_type = #tpu.core_type<tc>, window_params = [{transform_indices = @transform_0, window_bounds = array<i64: 1, 4, 512>}, {pipeline_mode = #tpu.pipeline_mode<synchronous>, transform_indices = @transform_1, window_bounds = array<i64: 2, 512>}, {pipeline_mode = #tpu.pipeline_mode<synchronous>, transform_indices = @transform_2, window_bounds = array<i64: 8, 112>}, {pipeline_mode = #tpu.pipeline_mode<synchronous>, transform_indices = @transform_3, window_bounds = array<i64: 8, 1>}, {pipeline_mode = #tpu.pipeline_mode<synchronous>, transform_indices = @transform_4, window_bounds = array<i64: 8, 1>}, {pipeline_mode = #tpu.pipeline_mode<synchronous>, transform_indices = @transform_5, window_bounds = array<i64: 8, 1>}, {pipeline_mode = #tpu.pipeline_mode<synchronous>, transform_indices = @transform_6, window_bounds = array<i64: 8, 8>}, {pipeline_mode = #tpu.pipeline_mode<synchronous>, transform_indices = @transform_7, window_bounds = array<i64: 8, 1>}, {pipeline_mode = #tpu.pipeline_mode<synchronous>, transform_indices = @transform_8, window_bounds = array<i64: 1, 1>}, {transform_indices = @transform_9, window_bounds = array<i64: 1, 1, 512>}, {transform_indices = @transform_10, window_bounds = array<i64: 1, 8, 512>}]} {
    %c0 = arith.constant 0 : index
    %c0_0 = arith.constant 0 : index
    %c0_1 = arith.constant 0 : index
    %0 = vector.load %arg1[%c0, %c0_0, %c0_1] : memref<1x4x512xf32, #tpu.memory_space<vmem>>, vector<1x4x512xf32>
    %1 = vector.shape_cast %0 : vector<1x4x512xf32> to vector<4x512xf32>
    %cst = arith.constant 0.000000e+00 : f32
    %2 = vector.broadcast %cst : f32 to vector<112x768xf32>
    %c0_2 = arith.constant 0 : index
    %c0_3 = arith.constant 0 : index
    %3 = vector.load %arg12[%c0_2, %c0_3] : memref<112x768xf32, #tpu.memory_space<vmem>>, vector<112x768xf32>
    tpu.vector_store %arg12[%c0_2, %c0_3], %2 {strides = array<i32>} : memref<112x768xf32, #tpu.memory_space<vmem>>, vector<112x768xf32>,
    %c0_4 = arith.constant 0 : index
    %c0_5 = arith.constant 0 : index
    %4 = vector.load %arg2[%c0_4, %c0_5] : memref<2x512xi32, #tpu.memory_space<vmem>>, vector<1x512xi32>
    %c1 = arith.constant 1 : index
    %c0_6 = arith.constant 0 : index
    %5 = vector.load %arg2[%c1, %c0_6] : memref<2x512xi32, #tpu.memory_space<vmem>>, vector<1x512xi32>
    %c7_i32 = arith.constant 7 : i32
    %6 = vector.broadcast %c7_i32 : i32 to vector<1x512xi32>
    %7 = arith.cmpi ne, %4, %6 : vector<1x512xi32>
    %c0_i32 = arith.constant 0 : i32
    %8 = vector.broadcast %c0_i32 : i32 to vector<1x512xi32>
    %9 = arith.cmpi ne, %4, %8 : vector<1x512xi32>
    %c7_i32_7 = arith.constant 7 : i32
    %10 = vector.broadcast %c7_i32_7 : i32 to vector<1x512xi32>
    %11 = arith.cmpi ne, %5, %10 : vector<1x512xi32>
    %c0_i32_8 = arith.constant 0 : i32
    %12 = vector.broadcast %c0_i32_8 : i32 to vector<1x512xi32>
    %13 = arith.cmpi ne, %5, %12 : vector<1x512xi32>
    %14 = arith.andi %7, %11 : vector<1x512xi1>
    %cst_9 = arith.constant 0.000000e+00 : f32
    %15 = vector.shape_cast %14 : vector<1x512xi1> to vector<1x512xi1>
    %16 = vector.broadcast %15 : vector<1x512xi1> to vector<4x512xi1>
    %17 = vector.broadcast %cst_9 : f32 to vector<4x512xf32>
    %18 = arith.select %16, %1, %17 : vector<4x512xi1>, vector<4x512xf32>
    %c0_10 = arith.constant 0 : index
    %c201 = arith.constant 201 : index
    %19 = vector.load %arg12[%c0_10, %c201] : memref<112x768xf32, #tpu.memory_space<vmem>>, vector<4x512xf32>
    tpu.vector_store %arg12[%c0_10, %c201], %18 {strides = array<i32>} : memref<112x768xf32, #tpu.memory_space<vmem>>, vector<4x512xf32>,
    %c36 = arith.constant 36 : index
    %c137 = arith.constant 137 : index
    %20 = vector.load %arg12[%c36, %c137] : memref<112x768xf32, #tpu.memory_space<vmem>>, vector<4x512xf32>
    tpu.vector_store %arg12[%c36, %c137], %18 {strides = array<i32>} : memref<112x768xf32, #tpu.memory_space<vmem>>, vector<4x512xf32>,
    %c72 = arith.constant 72 : index
    %c73 = arith.constant 73 : index
    %21 = vector.load %arg12[%c72, %c73] : memref<112x768xf32, #tpu.memory_space<vmem>>, vector<4x512xf32>
    tpu.vector_store %arg12[%c72, %c73], %18 {strides = array<i32>} : memref<112x768xf32, #tpu.memory_space<vmem>>, vector<4x512xf32>,
    %cst_11 = arith.constant 0.000000e+00 : f32
    %22 = vector.shape_cast %7 : vector<1x512xi1> to vector<1x512xi1>
    %23 = vector.broadcast %22 : vector<1x512xi1> to vector<4x512xi1>
    %24 = vector.broadcast %cst_11 : f32 to vector<4x512xf32>
    %25 = arith.select %23, %1, %24 : vector<4x512xi1>, vector<4x512xf32>
    %c4 = arith.constant 4 : index
    %c200 = arith.constant 200 : index
    %26 = vector.load %arg12[%c4, %c200] : memref<112x768xf32, #tpu.memory_space<vmem>>, vector<4x512xf32>
    tpu.vector_store %arg12[%c4, %c200], %25 {strides = array<i32>} : memref<112x768xf32, #tpu.memory_space<vmem>>, vector<4x512xf32>,
    %c40 = arith.constant 40 : index
    %c136 = arith.constant 136 : index
    %27 = vector.load %arg12[%c40, %c136] : memref<112x768xf32, #tpu.memory_space<vmem>>, vector<4x512xf32>
    tpu.vector_store %arg12[%c40, %c136], %25 {strides = array<i32>} : memref<112x768xf32, #tpu.memory_space<vmem>>, vector<4x512xf32>,
    %c76 = arith.constant 76 : index
    %c72_12 = arith.constant 72 : index
    %28 = vector.load %arg12[%c76, %c72_12] : memref<112x768xf32, #tpu.memory_space<vmem>>, vector<4x512xf32>
    tpu.vector_store %arg12[%c76, %c72_12], %25 {strides = array<i32>} : memref<112x768xf32, #tpu.memory_space<vmem>>, vector<4x512xf32>,
    %29 = arith.andi %7, %13 : vector<1x512xi1>
    %cst_13 = arith.constant 0.000000e+00 : f32
    %30 = vector.shape_cast %29 : vector<1x512xi1> to vector<1x512xi1>
    %31 = vector.broadcast %30 : vector<1x512xi1> to vector<4x512xi1>
    %32 = vector.broadcast %cst_13 : f32 to vector<4x512xf32>
    %33 = arith.select %31, %1, %32 : vector<4x512xi1>, vector<4x512xf32>
    %c8 = arith.constant 8 : index
    %c199 = arith.constant 199 : index
    %34 = vector.load %arg12[%c8, %c199] : memref<112x768xf32, #tpu.memory_space<vmem>>, vector<4x512xf32>
    tpu.vector_store %arg12[%c8, %c199], %33 {strides = array<i32>} : memref<112x768xf32, #tpu.memory_space<vmem>>, vector<4x512xf32>,
    %c44 = arith.constant 44 : index
    %c135 = arith.constant 135 : index
    %35 = vector.load %arg12[%c44, %c135] : memref<112x768xf32, #tpu.memory_space<vmem>>, vector<4x512xf32>
    tpu.vector_store %arg12[%c44, %c135], %33 {strides = array<i32>} : memref<112x768xf32, #tpu.memory_space<vmem>>, vector<4x512xf32>,
    %c80 = arith.constant 80 : index
    %c71 = arith.constant 71 : index
    %36 = vector.load %arg12[%c80, %c71] : memref<112x768xf32, #tpu.memory_space<vmem>>, vector<4x512xf32>
    tpu.vector_store %arg12[%c80, %c71], %33 {strides = array<i32>} : memref<112x768xf32, #tpu.memory_space<vmem>>, vector<4x512xf32>,
    %cst_14 = arith.constant 0.000000e+00 : f32
    %37 = vector.shape_cast %11 : vector<1x512xi1> to vector<1x512xi1>
    %38 = vector.broadcast %37 : vector<1x512xi1> to vector<4x512xi1>
    %39 = vector.broadcast %cst_14 : f32 to vector<4x512xf32>
    %40 = arith.select %38, %1, %39 : vector<4x512xi1>, vector<4x512xf32>
    %c12 = arith.constant 12 : index
    %c193 = arith.constant 193 : index
    %41 = vector.load %arg12[%c12, %c193] : memref<112x768xf32, #tpu.memory_space<vmem>>, vector<4x512xf32>
    tpu.vector_store %arg12[%c12, %c193], %40 {strides = array<i32>} : memref<112x768xf32, #tpu.memory_space<vmem>>, vector<4x512xf32>,
    %c48 = arith.constant 48 : index
    %c129 = arith.constant 129 : index
    %42 = vector.load %arg12[%c48, %c129] : memref<112x768xf32, #tpu.memory_space<vmem>>, vector<4x512xf32>
    tpu.vector_store %arg12[%c48, %c129], %40 {strides = array<i32>} : memref<112x768xf32, #tpu.memory_space<vmem>>, vector<4x512xf32>,
    %c84 = arith.constant 84 : index
    %c65 = arith.constant 65 : index
    %43 = vector.load %arg12[%c84, %c65] : memref<112x768xf32, #tpu.memory_space<vmem>>, vector<4x512xf32>
    tpu.vector_store %arg12[%c84, %c65], %40 {strides = array<i32>} : memref<112x768xf32, #tpu.memory_space<vmem>>, vector<4x512xf32>,
    %c16 = arith.constant 16 : index
    %c192 = arith.constant 192 : index
    %44 = vector.load %arg12[%c16, %c192] : memref<112x768xf32, #tpu.memory_space<vmem>>, vector<4x512xf32>
    tpu.vector_store %arg12[%c16, %c192], %1 {strides = array<i32>} : memref<112x768xf32, #tpu.memory_space<vmem>>, vector<4x512xf32>,
    %c52 = arith.constant 52 : index
    %c128 = arith.constant 128 : index
    %45 = vector.load %arg12[%c52, %c128] : memref<112x768xf32, #tpu.memory_space<vmem>>, vector<4x512xf32>
    tpu.vector_store %arg12[%c52, %c128], %1 {strides = array<i32>} : memref<112x768xf32, #tpu.memory_space<vmem>>, vector<4x512xf32>,
    %c88 = arith.constant 88 : index
    %c64 = arith.constant 64 : index
    %46 = vector.load %arg12[%c88, %c64] : memref<112x768xf32, #tpu.memory_space<vmem>>, vector<4x512xf32>
    tpu.vector_store %arg12[%c88, %c64], %1 {strides = array<i32>} : memref<112x768xf32, #tpu.memory_space<vmem>>, vector<4x512xf32>,
    %cst_15 = arith.constant 0.000000e+00 : f32
    %47 = vector.shape_cast %13 : vector<1x512xi1> to vector<1x512xi1>
    %48 = vector.broadcast %47 : vector<1x512xi1> to vector<4x512xi1>
    %49 = vector.broadcast %cst_15 : f32 to vector<4x512xf32>
    %50 = arith.select %48, %1, %49 : vector<4x512xi1>, vector<4x512xf32>
    %c20 = arith.constant 20 : index
    %c191 = arith.constant 191 : index
    %51 = vector.load %arg12[%c20, %c191] : memref<112x768xf32, #tpu.memory_space<vmem>>, vector<4x512xf32>
    tpu.vector_store %arg12[%c20, %c191], %50 {strides = array<i32>} : memref<112x768xf32, #tpu.memory_space<vmem>>, vector<4x512xf32>,
    %c56 = arith.constant 56 : index
    %c127 = arith.constant 127 : index
    %52 = vector.load %arg12[%c56, %c127] : memref<112x768xf32, #tpu.memory_space<vmem>>, vector<4x512xf32>
    tpu.vector_store %arg12[%c56, %c127], %50 {strides = array<i32>} : memref<112x768xf32, #tpu.memory_space<vmem>>, vector<4x512xf32>,
    %c92 = arith.constant 92 : index
    %c63 = arith.constant 63 : index
    %53 = vector.load %arg12[%c92, %c63] : memref<112x768xf32, #tpu.memory_space<vmem>>, vector<4x512xf32>
    tpu.vector_store %arg12[%c92, %c63], %50 {strides = array<i32>} : memref<112x768xf32, #tpu.memory_space<vmem>>, vector<4x512xf32>,
    %54 = arith.andi %9, %11 : vector<1x512xi1>
    %cst_16 = arith.constant 0.000000e+00 : f32
    %55 = vector.shape_cast %54 : vector<1x512xi1> to vector<1x512xi1>
    %56 = vector.broadcast %55 : vector<1x512xi1> to vector<4x512xi1>
    %57 = vector.broadcast %cst_16 : f32 to vector<4x512xf32>
    %58 = arith.select %56, %1, %57 : vector<4x512xi1>, vector<4x512xf32>
    %c24 = arith.constant 24 : index
    %c185 = arith.constant 185 : index
    %59 = vector.load %arg12[%c24, %c185] : memref<112x768xf32, #tpu.memory_space<vmem>>, vector<4x512xf32>
    tpu.vector_store %arg12[%c24, %c185], %58 {strides = array<i32>} : memref<112x768xf32, #tpu.memory_space<vmem>>, vector<4x512xf32>,
    %c60 = arith.constant 60 : index
    %c121 = arith.constant 121 : index
    %60 = vector.load %arg12[%c60, %c121] : memref<112x768xf32, #tpu.memory_space<vmem>>, vector<4x512xf32>
    tpu.vector_store %arg12[%c60, %c121], %58 {strides = array<i32>} : memref<112x768xf32, #tpu.memory_space<vmem>>, vector<4x512xf32>,
    %c96 = arith.constant 96 : index
    %c57 = arith.constant 57 : index
    %61 = vector.load %arg12[%c96, %c57] : memref<112x768xf32, #tpu.memory_space<vmem>>, vector<4x512xf32>
    tpu.vector_store %arg12[%c96, %c57], %58 {strides = array<i32>} : memref<112x768xf32, #tpu.memory_space<vmem>>, vector<4x512xf32>,
    %cst_17 = arith.constant 0.000000e+00 : f32
    %62 = vector.shape_cast %9 : vector<1x512xi1> to vector<1x512xi1>
    %63 = vector.broadcast %62 : vector<1x512xi1> to vector<4x512xi1>
    %64 = vector.broadcast %cst_17 : f32 to vector<4x512xf32>
    %65 = arith.select %63, %1, %64 : vector<4x512xi1>, vector<4x512xf32>
    %c28 = arith.constant 28 : index
    %c184 = arith.constant 184 : index
    %66 = vector.load %arg12[%c28, %c184] : memref<112x768xf32, #tpu.memory_space<vmem>>, vector<4x512xf32>
    tpu.vector_store %arg12[%c28, %c184], %65 {strides = array<i32>} : memref<112x768xf32, #tpu.memory_space<vmem>>, vector<4x512xf32>,
    %c64_18 = arith.constant 64 : index
    %c120 = arith.constant 120 : index
    %67 = vector.load %arg12[%c64_18, %c120] : memref<112x768xf32, #tpu.memory_space<vmem>>, vector<4x512xf32>
    tpu.vector_store %arg12[%c64_18, %c120], %65 {strides = array<i32>} : memref<112x768xf32, #tpu.memory_space<vmem>>, vector<4x512xf32>,
    %c100 = arith.constant 100 : index
    %c56_19 = arith.constant 56 : index
    %68 = vector.load %arg12[%c100, %c56_19] : memref<112x768xf32, #tpu.memory_space<vmem>>, vector<4x512xf32>
    tpu.vector_store %arg12[%c100, %c56_19], %65 {strides = array<i32>} : memref<112x768xf32, #tpu.memory_space<vmem>>, vector<4x512xf32>,
    %69 = arith.andi %9, %13 : vector<1x512xi1>
    %cst_20 = arith.constant 0.000000e+00 : f32
    %70 = vector.shape_cast %69 : vector<1x512xi1> to vector<1x512xi1>
    %71 = vector.broadcast %70 : vector<1x512xi1> to vector<4x512xi1>
    %72 = vector.broadcast %cst_20 : f32 to vector<4x512xf32>
    %73 = arith.select %71, %1, %72 : vector<4x512xi1>, vector<4x512xf32>
    %c32 = arith.constant 32 : index
    %c183 = arith.constant 183 : index
    %74 = vector.load %arg12[%c32, %c183] : memref<112x768xf32, #tpu.memory_space<vmem>>, vector<4x512xf32>
    tpu.vector_store %arg12[%c32, %c183], %73 {strides = array<i32>} : memref<112x768xf32, #tpu.memory_space<vmem>>, vector<4x512xf32>,
    %c68 = arith.constant 68 : index
    %c119 = arith.constant 119 : index
    %75 = vector.load %arg12[%c68, %c119] : memref<112x768xf32, #tpu.memory_space<vmem>>, vector<4x512xf32>
    tpu.vector_store %arg12[%c68, %c119], %73 {strides = array<i32>} : memref<112x768xf32, #tpu.memory_space<vmem>>, vector<4x512xf32>,
    %c104 = arith.constant 104 : index
    %c55 = arith.constant 55 : index
    %76 = vector.load %arg12[%c104, %c55] : memref<112x768xf32, #tpu.memory_space<vmem>>, vector<4x512xf32>
    tpu.vector_store %arg12[%c104, %c55], %73 {strides = array<i32>} : memref<112x768xf32, #tpu.memory_space<vmem>>, vector<4x512xf32>,
    %c0_21 = arith.constant 0 : index
    %c128_22 = arith.constant 128 : index
    %77 = vector.load %arg12[%c0_21, %c128_22] : memref<112x768xf32, #tpu.memory_space<vmem>>, vector<112x512xf32>
    %c0_23 = arith.constant 0 : index
    %c0_24 = arith.constant 0 : index
    %78 = vector.load %arg3[%c0_23, %c0_24] : memref<8x112xf32, #tpu.memory_space<vmem>>, vector<8x112xf32>
    %cst_25 = arith.constant dense<0.000000e+00> : vector<8x512xf32>
    %79 = tpu.matmul %78, %77, %cst_25 {dimension_numbers = #tpu.dot_dimension_numbers<[1], [0], [0], [1], [0, 0, 1, 1], [], []>} : vector<8x112xf32>, vector<112x512xf32>, vector<8x512xf32> -> vector<8x512xf32>
    %c0_26 = arith.constant 0 : index
    %c0_27 = arith.constant 0 : index
    %80 = vector.load %arg4[%c0_26, %c0_27] : memref<8x1xf32, #tpu.memory_space<vmem>>, vector<8x1xf32>
    %81 = vector.broadcast %80 : vector<8x1xf32> to vector<8x512xf32>
    %82 = arith.addf %79, %81 : vector<8x512xf32>
    %cst_28 = arith.constant dense<0.000000e+00> : vector<8xf32>
    %83 = vector.multi_reduction <add>, %82, %cst_28 [1] : vector<8x512xf32> to vector<8xf32>
    %84 = vector.shape_cast %83 : vector<8xf32> to vector<8x1xf32>
    %c0_29 = arith.constant 0 : index
    %c0_30 = arith.constant 0 : index
    %85 = vector.load %arg7[%c0_29, %c0_30] : memref<8x8xf32, #tpu.memory_space<vmem>>, vector<8x8xf32>
    %cst_31 = arith.constant dense<0.000000e+00> : vector<8x1xf32>
    %86 = tpu.matmul %85, %84, %cst_31 {dimension_numbers = #tpu.dot_dimension_numbers<[1], [0], [0], [1], [0, 0, 1, 1], [], []>} : vector<8x8xf32>, vector<8x1xf32>, vector<8x1xf32> -> vector<8x1xf32>
    %87 = vector.broadcast %86 : vector<8x1xf32> to vector<8x512xf32>
    %88 = arith.subf %82, %87 : vector<8x512xf32>
    %89 = arith.mulf %88, %88 : vector<8x512xf32>
    %cst_32 = arith.constant dense<0.000000e+00> : vector<8xf32>
    %90 = vector.multi_reduction <add>, %89, %cst_32 [1] : vector<8x512xf32> to vector<8xf32>
    %91 = vector.shape_cast %90 : vector<8xf32> to vector<8x1xf32>
    %c0_33 = arith.constant 0 : index
    %c0_34 = arith.constant 0 : index
    %92 = vector.load %arg7[%c0_33, %c0_34] : memref<8x8xf32, #tpu.memory_space<vmem>>, vector<8x8xf32>
    %cst_35 = arith.constant dense<0.000000e+00> : vector<8x1xf32>
    %93 = tpu.matmul %92, %91, %cst_35 {dimension_numbers = #tpu.dot_dimension_numbers<[1], [0], [0], [1], [0, 0, 1, 1], [], []>} : vector<8x8xf32>, vector<8x1xf32>, vector<8x1xf32> -> vector<8x1xf32>
    %cst_36 = arith.constant 0.000000e+00 : f32
    %94 = vector.broadcast %cst_36 : f32 to vector<8x1xf32>
    %95 = arith.maximumf %93, %94 : vector<8x1xf32>
    %cst_37 = arith.constant 9.99999974E-6 : f32
    %96 = vector.broadcast %cst_37 : f32 to vector<8x1xf32>
    %97 = arith.addf %95, %96 : vector<8x1xf32>
    %98 = math.rsqrt %97 : vector<8x1xf32>
    %99 = vector.broadcast %98 : vector<8x1xf32> to vector<8x512xf32>
    %100 = arith.mulf %88, %99 : vector<8x512xf32>
    %c0_38 = arith.constant 0 : index
    %c0_39 = arith.constant 0 : index
    %101 = vector.load %arg5[%c0_38, %c0_39] : memref<8x1xf32, #tpu.memory_space<vmem>>, vector<8x1xf32>
    %102 = vector.broadcast %101 : vector<8x1xf32> to vector<8x512xf32>
    %103 = arith.mulf %100, %102 : vector<8x512xf32>
    %c0_40 = arith.constant 0 : index
    %c0_41 = arith.constant 0 : index
    %104 = vector.load %arg6[%c0_40, %c0_41] : memref<8x1xf32, #tpu.memory_space<vmem>>, vector<8x1xf32>
    %105 = vector.broadcast %104 : vector<8x1xf32> to vector<8x512xf32>
    %106 = arith.addf %103, %105 : vector<8x512xf32>
    %cst_42 = arith.constant 0.000000e+00 : f32
    %107 = vector.broadcast %cst_42 : f32 to vector<8x512xf32>
    %108 = arith.maximumf %106, %107 : vector<8x512xf32>
    %c0_43 = arith.constant 0 : index
    %c0_44 = arith.constant 0 : index
    %c0_45 = arith.constant 0 : index
    %109 = vector.load %arg11[%c0_43, %c0_44, %c0_45] : memref<1x8x512xf32, #tpu.memory_space<vmem>>, vector<1x8x512xf32>
    %110 = vector.shape_cast %109 : vector<1x8x512xf32> to vector<8x512xf32>
    %111 = vector.shape_cast %108 : vector<8x512xf32> to vector<1x8x512xf32>
    tpu.vector_store %arg11[%c0_43, %c0_44, %c0_45], %111 {strides = array<i32>} : memref<1x8x512xf32, #tpu.memory_space<vmem>>, vector<1x8x512xf32>,
    %c0_46 = arith.constant 0 : index
    %c0_47 = arith.constant 0 : index
    %112 = vector.load %arg8[%c0_46, %c0_47] : memref<8x1xf32, #tpu.memory_space<vmem>>, vector<8x1xf32>
    %113 = vector.broadcast %112 : vector<8x1xf32> to vector<8x512xf32>
    %114 = arith.mulf %108, %113 : vector<8x512xf32>
    %cst_48 = arith.constant dense<0.000000e+00> : vector<512xf32>
    %115 = vector.multi_reduction <add>, %114, %cst_48 [0] : vector<8x512xf32> to vector<512xf32>
    %116 = vector.shape_cast %115 : vector<512xf32> to vector<1x512xf32>
    %c0_49 = arith.constant 0 : index
    %c0_50 = arith.constant 0 : index
    %117 = vector.load %arg9[%c0_49, %c0_50] : memref<1x1xf32, #tpu.memory_space<vmem>>, vector<1x1xf32>
    %118 = vector.broadcast %117 : vector<1x1xf32> to vector<1x512xf32>
    %119 = arith.addf %116, %118 : vector<1x512xf32>
    %c0_51 = arith.constant 0 : index
    %c0_52 = arith.constant 0 : index
    %c0_53 = arith.constant 0 : index
    %120 = vector.load %arg10[%c0_51, %c0_52, %c0_53] : memref<1x1x512xf32, #tpu.memory_space<vmem>>, vector<1x1x512xf32>
    %121 = vector.shape_cast %120 : vector<1x1x512xf32> to vector<1x512xf32>
    %122 = vector.shape_cast %119 : vector<1x512xf32> to vector<1x1x512xf32>
    tpu.vector_store %arg10[%c0_51, %c0_52, %c0_53], %122 {strides = array<i32>} : memref<1x1x512xf32, #tpu.memory_space<vmem>>, vector<1x1x512xf32>,
    return
  }
  func.func @transform_0(%arg0: i32) -> (i32, i32, i32) {
    %c0_i32 = arith.constant 0 : i32
    %c0_i32_0 = arith.constant 0 : i32
    %c0_i32_1 = arith.constant 0 : i32
    return %arg0, %c0_i32, %c0_i32_0 : i32, i32, i32
  }
  func.func @transform_1(%arg0: i32) -> (i32, i32) {
    %c0_i32 = arith.constant 0 : i32
    %c0_i32_0 = arith.constant 0 : i32
    %c0_i32_1 = arith.constant 0 : i32
    return %c0_i32, %c0_i32_0 : i32, i32
  }
  func.func @transform_2(%arg0: i32) -> (i32, i32) {
    %c0_i32 = arith.constant 0 : i32
    %c0_i32_0 = arith.constant 0 : i32
    %c0_i32_1 = arith.constant 0 : i32
    return %c0_i32, %c0_i32_0 : i32, i32
  }
  func.func @transform_3(%arg0: i32) -> (i32, i32) {
    %c0_i32 = arith.constant 0 : i32
    %c0_i32_0 = arith.constant 0 : i32
    %c0_i32_1 = arith.constant 0 : i32
    return %c0_i32, %c0_i32_0 : i32, i32
  }
  func.func @transform_4(%arg0: i32) -> (i32, i32) {
    %c0_i32 = arith.constant 0 : i32
    %c0_i32_0 = arith.constant 0 : i32
    %c0_i32_1 = arith.constant 0 : i32
    return %c0_i32, %c0_i32_0 : i32, i32
  }
  func.func @transform_5(%arg0: i32) -> (i32, i32) {
    %c0_i32 = arith.constant 0 : i32
    %c0_i32_0 = arith.constant 0 : i32
    %c0_i32_1 = arith.constant 0 : i32
    return %c0_i32, %c0_i32_0 : i32, i32
  }
  func.func @transform_6(%arg0: i32) -> (i32, i32) {
    %c0_i32 = arith.constant 0 : i32
    %c0_i32_0 = arith.constant 0 : i32
    %c0_i32_1 = arith.constant 0 : i32
    return %c0_i32, %c0_i32_0 : i32, i32
  }
  func.func @transform_7(%arg0: i32) -> (i32, i32) {
    %c0_i32 = arith.constant 0 : i32
    %c0_i32_0 = arith.constant 0 : i32
    %c0_i32_1 = arith.constant 0 : i32
    return %c0_i32, %c0_i32_0 : i32, i32
  }
  func.func @transform_8(%arg0: i32) -> (i32, i32) {
    %c0_i32 = arith.constant 0 : i32
    %c0_i32_0 = arith.constant 0 : i32
    %c0_i32_1 = arith.constant 0 : i32
    return %c0_i32, %c0_i32_0 : i32, i32
  }
  func.func @transform_9(%arg0: i32) -> (i32, i32, i32) {
    %c0_i32 = arith.constant 0 : i32
    %c0_i32_0 = arith.constant 0 : i32
    %c0_i32_1 = arith.constant 0 : i32
    return %arg0, %c0_i32, %c0_i32_0 : i32, i32, i32
  }
  func.func @transform_10(%arg0: i32) -> (i32, i32, i32) {
    %c0_i32 = arith.constant 0 : i32
    %c0_i32_0 = arith.constant 0 : i32
    %c0_i32_1 = arith.constant 0 : i32
    return %arg0, %c0_i32, %c0_i32_0 : i32, i32, i32
  }
}

</mosaic_0001>

<bundles_post_ra>
// kernel: tile.9
= control target key start
LH: loop header
LB: loop body
LE: loop exit
PB: predicated region body
PF: predicated region fallthrough
CT: control target
= control target key end

     0   :  { %vm3_vm0 = vcmask 523264   ;;  %vm11_vm1 = vcmask 1048064   ;;  %s78_s0 = inlined_call_operand.vmem [shape: s32[2,8,64], index: 0, kind: input, shape index: {}]   ;;  %s79_s1 = inlined_call_operand.vmem [shape: s32[2,512], index: 1, kind: output, shape index: {}]  }
   0x1   :  { %v44_v0 = vld.sshfl [vmem:[%s78_s0 + $0x1] sm:$0xff pattern:$0xe6c4a280]   ;;  %v2_v1 = vld [vmem:[%s78_s0] ss:$2 sm:$0xff]   ;;  %s49_s0 = smov 64  }
   0x2   :  { %9 = vrot.lane.b32.xlu0 %v44_v0, %s49_s0  ;;  %4 = vst.msk [vmem:[#allocation0] ss:$8 sm:$0xf] %vm3_vm0, %v2_v1   ;;  %6 = vst.msk [vmem:[#allocation0 - $0x1f] ss:$8 sm:$0xf0] %vm3_vm0, %v2_v1  }
  0x74   :  { %v10_v2 = vpop.permute.xlu0 %9  }
  0x75   :  { %12 = vst.msk [vmem:[#allocation0] sm:$0x3] %vm11_vm1, %v10_v2   ;;  %14 = vst.msk [vmem:[#allocation0 + $0x6] sm:$0xc] %vm11_vm1, %v10_v2  }
  0x76   :  { %16 = vst.msk [vmem:[#allocation0 + $0xc] sm:$0x30] %vm11_vm1, %v10_v2   ;;  %18 = vst.msk [vmem:[#allocation0 + $0x12] sm:$0xc0] %vm11_vm1, %v10_v2  }
  0x7c   :  { %v22_v3 = vld [vmem:[#allocation0] sm:$0x3]  ;;  %v26_v4 = vld [vmem:[#allocation0 + $0x8] sm:$0x3] }
  0x7d   :  { %v31_v5 = vld [vmem:[#allocation0 + $0x10] sm:$0x3]  ;;  %24 = vst [vmem:[%s79_s1] sm:$0x3] %v22_v3  ;;  %45 = vst [vmem:[%s79_s1 + $0x2] sm:$0x3] %v26_v4 }
  0x7e   :  { %46 = vst [vmem:[%s79_s1 + $0x4] sm:$0x3] %v31_v5  ;;  %v37_v6 = vld [vmem:[#allocation0 + $0x18] sm:$0x3] }
  0x7f   :  { %47 = vst [vmem:[%s79_s1 + $0x6] sm:$0x3] %v37_v6 }

// kernel: conv_bias_forward.1
= control target key start
LH: loop header
LB: loop body
LE: loop exit
PB: predicated region body
PF: predicated region fallthrough
CT: control target
= control target key end

     0   :  { %s1997_s15 = smov 0   ;;  %s2436_s0 = inlined_call_operand.vmem [shape: f32[2,4,512], index: 0, kind: input, shape index: {}]   ;;  %s2437_s1 = inlined_call_operand.vmem [shape: s32[2,512], index: 1, kind: input, shape index: {}]   ;;  %s2438_s2 = inlined_call_operand.vmem [shape: f32[8,112], index: 2, kind: input, shape index: {}]   ;;  %s2439_s3 = inlined_call_operand.vmem [shape: f32[8,1], index: 3, kind: input, shape index: {}]   ;;  %s2440_s4 = inlined_call_operand.vmem [shape: f32[8,1], index: 4, kind: input, shape index: {}]   ;;  %s2441_s5 = inlined_call_operand.vmem [shape: f32[8,1], index: 5, kind: input, shape index: {}]   ;;  %s2442_s6 = inlined_call_operand.vmem [shape: f32[8,8], index: 6, kind: input, shape index: {}]   ;;  %s2443_s7 = inlined_call_operand.vmem [shape: f32[8,1], index: 7, kind: input, shape index: {}]   ;;  %s2444_s8 = inlined_call_operand.<no memory space> [shape: f32[1,1], index: 8, kind: input, shape index: {}]   ;;  %s2445_s9 = inlined_call_operand.vmem [shape: f32[2,1,512], index: 9, kind: output, shape index: {0}]   ;;  %s2446_s10 = inlined_call_operand.vmem [shape: f32[2,8,512], index: 10, kind: output, shape index: {1}]  }
   0x1   :  { %v16_v0 = vstv %s2444_s8 }
   0x2   :  { %17 = vst [vmem:[#allocation3] sm:$0x1] %v16_v0 }
   0x3 LB: > { %s1785_s16 = sadd.s32 4294967295, %s1916_s15   ;;  %p1789_p0 = scmp.ge.s32.totalorder %s1916_s15, 1  ;;  %s1916_s15 = sphi %s1997_s15, %s23_s15  }
   0x4   : > { %p317_p1 = scmp.lt.s32.totalorder %s1916_s15, 3 }
   0x6   : > { %p318_p2 = pnand %p1789_p0, %p317_p1 }
   0x7   : > { %p359_p3 = scmp.lt.s32.totalorder (!%p318_p2), %s1785_s16, 1  ;;  %v2008_v1 = vld [vmem:[%s2437_s1] ss:$2 sm:$0xf] (!%p318_p2)  ;;  %v468_v2 = vlaneseq (!%p318_p2)  ;;  %v1918_v4 = vmov (!%p318_p2), 0   ;;  %v1919_v12 = vmov (!%p318_p2), 0.0  }
   0x8   : > { %321 = sbr.rel (%p318_p2) target bundleno = 1534 (0x5fe), region = 56  ;;  %v2013_v3 = vld [vmem:[%s2437_s1 + $0x1] ss:$2 sm:$0xf] (!%p318_p2)  ;;  %vm462_vm0 = vcmp.ne.s32.totalorder (!%p318_p2), %v2008_v1, 7  ;;  %1903 = vset.pattern.permute.xlu0 (!%p318_p2), %v1918_v4  ;;  %1904 = vset.pattern.permute.xlu1 (!%p318_p2), %v1918_v4  ;;  %376 = vst [vmem:[#allocation2 + $0x8] sm:$0xff] (!%p318_p2), %v1919_v12 }
   0x9   : > { %vm464_vm1 = vcmp.ne.s32.totalorder (!%p318_p2), %v2013_v3, 7  ;;  %v2022_v5 = vshrl.u32 (!%p318_p2), %v468_v2, 7  ;;  %vm465_vm2 = vcmp.ne.s32.totalorder (!%p318_p2), %v2013_v3, 0  ;;  %v2028_v6 = vsel (!%p318_p2), %vm462_vm0, 1, %v1918_v4  ;;  %375 = vst [vmem:[#allocation2] sm:$0xff] (!%p318_p2), %v1919_v12  ;;  %377 = vst [vmem:[#allocation2 + $0x10] sm:$0xff] (!%p318_p2), %v1919_v12  ;;  %1332 = vmatprep.mubr.f32.mxu0 (!%p318_p2), %v1919_v12  ;;  %1403 = vmatprep.mubr.f32.mxu1 (!%p318_p2), %v1919_v12 }
   0xa   : > { %vm466_vm3 = vmand (!%p318_p2), %vm462_vm0, %vm464_vm1  ;;  %v2049_v11 = vsel (!%p318_p2), %vm464_vm1, 1, %v1918_v4  ;;  %378 = vst [vmem:[#allocation2 + $0x18] sm:$0xff] (!%p318_p2), %v1919_v12  ;;  %s1920_s24 = smov (!%p318_p2), 73   ;;  %s1921_s25 = smov (!%p318_p2), 71   ;;  %v855_v54 = vsel (!%p318_p2), %vm465_vm2, 1, %v1918_v4 }
   0xb   : > { %v2032_v7 = vsel (!%p318_p2), %vm466_vm3, 1, %v1918_v4  ;;  %v2035_v8 = vsub.s32 (!%p318_p2), 0, %v2022_v5  ;;  %v2038_v9 = vsub.s32 (!%p318_p2), 1, %v2022_v5  ;;  %vm2042_vm4 = vmand (!%p318_p2), %vm462_vm0, %vm465_vm2  ;;  %379 = vst [vmem:[#allocation2 + $0x20] sm:$0xff] (!%p318_p2), %v1919_v12  ;;  %v2105_v30 = vsub.s32 (!%p318_p2), 3, %v2022_v5  ;;  %s1922_s26 = smov (!%p318_p2), 72  }
   0xc   : > { %382 = vst [vmem:[#allocation2 + $0x38] sm:$0xff] (!%p318_p2), %v1919_v12  ;;  %383 = vst [vmem:[#allocation2 + $0x40] sm:$0xff] (!%p318_p2), %v1919_v12  ;;  %v2059_v13 = vsel (!%p318_p2), %vm2042_vm4, 1, %v1918_v4  ;;  %v2111_v32 = vsub.s32 (!%p318_p2), 2, %v2022_v5  ;;  %s1923_s27 = smov (!%p318_p2), 65   ;;  %s1924_s28 = smov (!%p318_p2), 64  }
   0xd   : > { %384 = vst [vmem:[#allocation2 + $0x48] sm:$0xff] (!%p318_p2), %v1919_v12  ;;  %385 = vst [vmem:[#allocation2 + $0x50] sm:$0xff] (!%p318_p2), %v1919_v12  ;;  %v471_v16 = vrot.slane (!%p318_p2), %v2032_v7, %v2035_v8  ;;  %v654_v17 = vrot.slane (!%p318_p2), %v2059_v13, %v2038_v9  ;;  %v563_v18 = vrot.slane (!%p318_p2), %v2028_v6, %v2035_v8  ;;  %s1925_s29 = smov (!%p318_p2), 63   ;;  %s1926_s30 = smov (!%p318_p2), 57  }
   0xe   : > { %388 = vst [vmem:[#allocation2 + $0x68] sm:$0xff] (!%p318_p2), %v1919_v12  ;;  %389 = vst [vmem:[#allocation2 + $0x70] sm:$0xff] (!%p318_p2), %v1919_v12  ;;  %v475_v19 = vrot.slane (!%p318_p2), %v2032_v7, %v2038_v9  ;;  %v567_v21 = vrot.slane (!%p318_p2), %v2028_v6, %v2038_v9  ;;  %v650_v22 = vrot.slane (!%p318_p2), %v2059_v13, %v2035_v8  ;;  %s1927_s11 = smov (!%p318_p2), 56   ;;  %s1928_s12 = smov (!%p318_p2), 9  }
   0xf   : > { %s2450_s16 = smov (!%p359_p3, %s1785_s16), 1  ;;  %390 = vst [vmem:[#allocation2 + $0x78] sm:$0xff] %v1919_v12  ;;  %391 = vst [vmem:[#allocation2 + $0x80] sm:$0xff] %v1919_v12  ;;  %v740_v23 = vrot.slane %v2049_v11, %v2038_v9  ;;  %vm484_vm5 = vcmp.eq.s32.totalorder %v471_v16, 1  ;;  %vm664_vm6 = vcmp.eq.s32.totalorder %v654_v17, 1  ;;  %vm576_vm7 = vcmp.eq.s32.totalorder %v563_v18, 1 }
  0x10   : > { %s1802_s20 = sshll.u32 %s2450_s16, 4  ;;  %394 = vst [vmem:[#allocation2 + $0x98] sm:$0xff] %v1919_v12  ;;  %395 = vst [vmem:[#allocation2 + $0xa0] sm:$0xff] %v1919_v12  ;;  %vm485_vm8 = vcmp.eq.s32.totalorder %v475_v19, 1  ;;  %vm577_vm9 = vcmp.eq.s32.totalorder %v567_v21, 1  ;;  %v736_v29 = vrot.slane %v2049_v11, %v2035_v8  ;;  %vm663_vm10 = vcmp.eq.s32.totalorder %v650_v22, 1 }
  0x11   : > { %396 = vst [vmem:[#allocation2 + $0xa8] sm:$0xff] %v1919_v12  ;;  %397 = vst [vmem:[#allocation2 + $0xb0] sm:$0xff] %v1919_v12  ;;  %s363_s23 = scalar_lea.vmem %s2436_s0, %s1802_s20  ;;  %vm750_vm11 = vcmp.eq.s32.totalorder %v740_v23, 1  ;;  %v483_v37 = vrot.slane %v2032_v7, %v2105_v30  ;;  %v479_v38 = vrot.slane %v2032_v7, %v2111_v32  ;;  %v575_v39 = vrot.slane %v2028_v6, %v2105_v30  ;;  %s1929_s13 = smov 8  }
  0x12   : > { %400 = vst [vmem:[#allocation2 + $0xc8] sm:$0xff] %v1919_v12  ;;  %401 = vst [vmem:[#allocation2 + $0xd0] sm:$0xff] %v1919_v12  ;;  %v2061_v14 = vld [vmem:[%s363_s23] sm:$0xff]  ;;  %v2063_v15 = vld [vmem:[%s363_s23 + $0x8] sm:$0xff]  ;;  %vm749_vm12 = vcmp.eq.s32.totalorder %v736_v29, 1  ;;  %v571_v40 = vrot.slane %v2028_v6, %v2111_v32  ;;  %v662_v48 = vrot.slane %v2059_v13, %v2105_v30  ;;  %v658_v49 = vrot.slane %v2059_v13, %v2111_v32  ;;  %s1930_s14 = smov 7  }
  0x13   : > { %402 = vst [vmem:[#allocation2 + $0xd8] sm:$0xff] %v1919_v12  ;;  %403 = vst [vmem:[#allocation2 + $0xe0] sm:$0xff] %v1919_v12  ;;  %v2075_v20 = vcombine.high %v2061_v14, %v2061_v14  ;;  %v2086_v24 = vsel %vm484_vm5, %v2061_v14, 0.0  ;;  %v2092_v26 = vsel %vm576_vm7, %v2061_v14, 0.0  ;;  %v2118_v34 = vsel %vm663_vm10, %v2061_v14, 0.0  ;;  %s1931_s17 = smov 55  }
  0x14   : > { %406 = vst [vmem:[#allocation2 + $0xf8] sm:$0xff] %v1919_v12  ;;  %407 = vst [vmem:[#allocation2 + $0x100] sm:$0xff] %v1919_v12  ;;  %502 = vrot.lane.b32.xlu0 %v2086_v24, %s1920_s24  ;;  %v588_v27 = vrot.slane %v2092_v26, 4  ;;  %v2124_v36 = vsel %vm749_vm12, %v2061_v14, 0.0  ;;  %v2141_v43 = vcombine.high %v2063_v15, %v2063_v15  ;;  %vm487_vm13 = vcmp.eq.s32.totalorder %v483_v37, 1  ;;  %s1932_s18 = smov 1  }
  0x15   : > { %408 = vst [vmem:[#allocation2 + $0x108] sm:$0xff] %v1919_v12  ;;  %409 = vst [vmem:[#allocation2 + $0x110] sm:$0xff] %v1919_v12  ;;  %v2089_v25 = vsel %vm664_vm6, %v2075_v20, 0.0  ;;  %v2100_v28 = vsel %vm485_vm8, %v2075_v20, 0.0  ;;  %v2108_v31 = vsel %vm577_vm9, %v2075_v20, 0.0  ;;  %v2121_v35 = vsel %vm750_vm11, %v2075_v20, 0.0 }
  0x16   : > { %412 = vst [vmem:[#allocation2 + $0x128] sm:$0xff] %v1919_v12  ;;  %413 = vst [vmem:[#allocation2 + $0x130] sm:$0xff] %v1919_v12  ;;  %677 = vrot.lane.b32.xlu1 %v2089_v25, %s1921_s25  ;;  %v589_v33 = vrot.slane %v2108_v31, 4  ;;  %v762_v41 = vrot.slane %v2121_v35, 4  ;;  %v761_v42 = vrot.slane %v2124_v36, 4  ;;  %vm486_vm14 = vcmp.eq.s32.totalorder %v479_v38, 1 }
  0x17   : > { %414 = vst [vmem:[#allocation2 + $0x138] sm:$0xff] %v1919_v12  ;;  %415 = vst [vmem:[#allocation2 + $0x140] sm:$0xff] %v1919_v12  ;;  %vm579_vm15 = vcmp.eq.s32.totalorder %v575_v39, 1  ;;  %vm578_vm0 = vcmp.eq.s32.totalorder %v571_v40, 1  ;;  %v2146_v44 = vsel %vm487_vm13, %v2141_v43, 0.0  ;;  %v2149_v45 = vsel %vm486_vm14, %v2063_v15, 0.0 }
  0x18   : > { %418 = vst [vmem:[#allocation2 + $0x158] sm:$0xff] %v1919_v12  ;;  %419 = vst [vmem:[#allocation2 + $0x160] sm:$0xff] %v1919_v12  ;;  %504 = vrot.lane.b32.xlu0 %v2100_v28, %s1920_s24  ;;  %v2152_v46 = vsel %vm579_vm15, %v2141_v43, 0.0  ;;  %v2155_v47 = vsel %vm578_vm0, %v2063_v15, 0.0  ;;  %v748_v50 = vrot.slane %v2049_v11, %v2105_v30  ;;  %v744_v51 = vrot.slane %v2049_v11, %v2111_v32  ;;  %s1933_s8 = smov 127   ;;  %s1934_s19 = smov 121  }
  0x19   : > { %420 = vst [vmem:[#allocation2 + $0x168] sm:$0xff] %v1919_v12  ;;  %421 = vst [vmem:[#allocation2 + $0x170] sm:$0xff] %v1919_v12  ;;  %v591_v52 = vrot.slane %v2152_v46, 4  ;;  %v590_v53 = vrot.slane %v2155_v47, 4  ;;  %vm666_vm3 = vcmp.eq.s32.totalorder %v662_v48, 1  ;;  %vm665_vm4 = vcmp.eq.s32.totalorder %v658_v49, 1 }
  0x1a   : > { %424 = vst [vmem:[#allocation2 + $0x188] sm:$0xff] %v1919_v12  ;;  %425 = vst [vmem:[#allocation2 + $0x190] sm:$0xff] %v1919_v12  ;;  %592 = vrot.lane.b32.xlu1 %v588_v27, %s1922_s26  ;;  %vm752_vm5 = vcmp.eq.s32.totalorder %v748_v50, 1  ;;  %vm751_vm6 = vcmp.eq.s32.totalorder %v744_v51, 1  ;;  %vm463_vm7 = vcmp.ne.s32.totalorder %v2008_v1, 0  ;;  %v2182_v55 = vsel %vm666_vm3, %v2141_v43, 0.0 }
  0x1b   : > { %426 = vst [vmem:[#allocation2 + $0x198] sm:$0xff] %v1919_v12  ;;  %427 = vst [vmem:[#allocation2 + $0x1a0] sm:$0xff] %v1919_v12  ;;  %v2185_v56 = vsel %vm665_vm4, %v2063_v15, 0.0  ;;  %v2188_v57 = vsel %vm752_vm5, %v2141_v43, 0.0  ;;  %v2191_v58 = vsel %vm751_vm6, %v2063_v15, 0.0  ;;  %v863_v59 = vrot.slane %v855_v54, %v2038_v9  ;;  %s1935_s20 = smov 120  }
  0x1c   : > { %430 = vst [vmem:[#allocation2 + $0x1b8] sm:$0xff] %v1919_v12  ;;  %431 = vst [vmem:[#allocation2 + $0x1c0] sm:$0xff] %v1919_v12  ;;  %675 = vrot.lane.b32.xlu0 %v2118_v34, %s1921_s25  ;;  %v859_v60 = vrot.slane %v855_v54, %v2035_v8  ;;  %v764_v62 = vrot.slane %v2188_v57, 4  ;;  %v763_v63 = vrot.slane %v2191_v58, 4  ;;  %v1028_v3 = vsel %vm463_vm7, 1, %v1918_v4  ;;  %s1936_s21 = smov 119  }
  0x1d   : > { %432 = vst [vmem:[#allocation2 + $0x1c8] sm:$0xff] %v1919_v12  ;;  %433 = vst [vmem:[#allocation2 + $0x1d0] sm:$0xff] %v1919_v12  ;;  %vm873_vm9 = vcmp.eq.s32.totalorder %v863_v59, 1  ;;  %v1036_v17 = vrot.slane %v1028_v3, %v2038_v9  ;;  %v1032_v18 = vrot.slane %v1028_v3, %v2035_v8  ;;  %v871_v29 = vrot.slane %v855_v54, %v2105_v30 }
  0x1e   : > { %436 = vst [vmem:[#allocation2 + $0x1e8] sm:$0xff] %v1919_v12  ;;  %437 = vst [vmem:[#allocation2 + $0x1f0] sm:$0xff] %v1919_v12  ;;  %594 = vrot.lane.b32.xlu1 %v589_v33, %s1922_s26  ;;  %vm872_vm10 = vcmp.eq.s32.totalorder %v859_v60, 1  ;;  %v867_v33 = vrot.slane %v855_v54, %v2111_v32  ;;  %v1040_v48 = vrot.slane %v1028_v3, %v2111_v32  ;;  %v526_v60 = vrot.slane %v2086_v24, 4 }
  0x1f   : > { %438 = vst [vmem:[#allocation2 + $0x1f8] sm:$0xff] %v1919_v12  ;;  %439 = vst [vmem:[#allocation2 + $0x200] sm:$0xff] %v1919_v12  ;;  %v2227_v13 = vsel %vm872_vm10, %v2061_v14, 0.0  ;;  %vm1046_vm14 = vcmp.eq.s32.totalorder %v1036_v17, 1  ;;  %vm1045_vm15 = vcmp.eq.s32.totalorder %v1032_v18, 1  ;;  %vm875_vm0 = vcmp.eq.s32.totalorder %v871_v29, 1 }
  0x20   : > { %442 = vst [vmem:[#allocation2 + $0x218] sm:$0xff] %v1919_v12  ;;  %443 = vst [vmem:[#allocation2 + $0x220] sm:$0xff] %v1919_v12  ;;  %765 = vrot.lane.b32.xlu0 %v761_v42, %s1923_s27  ;;  %v884_v21 = vrot.slane %v2227_v13, 4  ;;  %v2251_v23 = vsel %vm1046_vm14, %v2075_v20, 0.0  ;;  %v2254_v27 = vsel %vm1045_vm15, %v2061_v14, 0.0  ;;  %vm874_vm3 = vcmp.eq.s32.totalorder %v867_v33, 1 }
  0x21   : > { %444 = vst [vmem:[#allocation2 + $0x228] sm:$0xff] %v1919_v12  ;;  %445 = vst [vmem:[#allocation2 + $0x230] sm:$0xff] %v1919_v12  ;;  %v1058_v37 = vrot.slane %v2251_v23, 4  ;;  %v1057_v38 = vrot.slane %v2254_v27, 4  ;;  %v2268_v39 = vsel %vm874_vm3, %v2063_v15, 0.0  ;;  %v1044_v42 = vrot.slane %v1028_v3, %v2105_v30 }
  0x22   : > { %448 = vst [vmem:[#allocation2 + $0x248] sm:$0xff] %v1919_v12  ;;  %449 = vst [vmem:[#allocation2 + $0x250] sm:$0xff] %v1919_v12  ;;  %767 = vrot.lane.b32.xlu1 %v762_v41, %s1923_s27  ;;  %v886_v50 = vrot.slane %v2268_v39, 4  ;;  %vm609_vm10 = vcmask 1048132   ;;  %vm773_vm14 = vcmask 531456   ;;  %vm782_vm15 = vcmask 1048076  }
  0x23   : > { %450 = vst [vmem:[#allocation2 + $0x258] sm:$0xff] %v1919_v12  ;;  %451 = vst [vmem:[#allocation2 + $0x260] sm:$0xff] %v1919_v12  ;;  %vm1048_vm6 = vcmp.eq.s32.totalorder %v1044_v42, 1  ;;  %vm614_vm3 = vcmask 588804   ;;  %v1258_v42 = vld [vmem:[%s2439_s3] sm:$0xff] }
  0x24   : > { %454 = vst [vmem:[#allocation2 + $0x278] sm:$0xff] %v1919_v12  ;;  %455 = vst [vmem:[#allocation2 + $0x280] sm:$0xff] %v1919_v12  ;;  %506 = vrot.lane.b32.xlu0 %v2149_v45, %s1920_s24 }
  0x25   : > { %456 = vst [vmem:[#allocation2 + $0x288] sm:$0xff] %v1919_v12  ;;  %457 = vst [vmem:[#allocation2 + $0x290] sm:$0xff] %v1919_v12  ;;  %v2224_v12 = vsel %vm873_vm9, %v2075_v20, 0.0  ;;  %vm519_vm9 = vcmask 1044040  }
  0x26   : > { %847 = vst [vmem:[#allocation2 + $0x130] sm:$0xf0] %v2061_v14  ;;  %849 = vst [vmem:[#allocation2 + $0x140] sm:$0xf0] %v2063_v15  ;;  %508 = vrot.lane.b32.xlu1 %v2146_v44, %s1920_s24  ;;  %v885_v19 = vrot.slane %v2224_v12, 4 }
  0x27   : > { %vm1114_vm8 = vmand %vm463_vm7, %vm465_vm2 }
  0x28   : > { %596 = vrot.lane.b32.xlu0 %v590_v53, %s1922_s26  ;;  %v2196_v61 = vsel %vm1114_vm8, 1, %v1918_v4  ;;  %vm941_vm2 = vmand %vm463_vm7, %vm464_vm1  ;;  %vm1047_vm7 = vcmp.eq.s32.totalorder %v1040_v48, 1 }
  0x29   : > { %v1123_v0 = vrot.slane %v2196_v61, %v2038_v9  ;;  %v1127_v6 = vrot.slane %v2196_v61, %v2111_v32  ;;  %v1131_v7 = vrot.slane %v2196_v61, %v2105_v30  ;;  %v942_v10 = vsel %vm941_vm2, 1, %v1918_v4 }
  0x2a   : > { %598 = vrot.lane.b32.xlu1 %v591_v52, %s1922_s26  ;;  %v950_v1 = vrot.slane %v942_v10, %v2038_v9  ;;  %v946_v4 = vrot.slane %v942_v10, %v2035_v8  ;;  %v958_v40 = vrot.slane %v942_v10, %v2105_v30  ;;  %v954_v41 = vrot.slane %v942_v10, %v2111_v32 }
  0x2b   : > { %vm1133_vm11 = vcmp.eq.s32.totalorder %v1123_v0, 1  ;;  %vm1135_vm1 = vcmp.eq.s32.totalorder %v1131_v7, 1  ;;  %v2287_v52 = vsel %vm1048_vm6, %v2141_v43, 0.0  ;;  %v2290_v53 = vsel %vm1047_vm7, %v2063_v15, 0.0 }
  0x2c   : > { %679 = vrot.lane.b32.xlu0 %v2185_v56, %s1921_s25  ;;  %v2219_v11 = vsel %vm1133_vm11, %v2075_v20, 0.0  ;;  %v2230_v16 = vsel %vm1135_vm1, %v2141_v43, 0.0  ;;  %vm960_vm12 = vcmp.eq.s32.totalorder %v950_v1, 1  ;;  %vm959_vm13 = vcmp.eq.s32.totalorder %v946_v4, 1 }
  0x2d   : > { %v2245_v9 = vsel %vm960_vm12, %v2075_v20, 0.0  ;;  %v2248_v22 = vsel %vm959_vm13, %v2061_v14, 0.0  ;;  %vm962_vm4 = vcmp.eq.s32.totalorder %v958_v40, 1  ;;  %vm961_vm5 = vcmp.eq.s32.totalorder %v954_v41, 1 }
  0x2e   : > { %681 = vrot.lane.b32.xlu1 %v2182_v55, %s1921_s25  ;;  %v2283_v30 = vsel %vm962_vm4, %v2141_v43, 0.0  ;;  %v965_v51 = vsel %vm961_vm5, %v2063_v15, 0.0  ;;  %v1060_v54 = vrot.slane %v2287_v52, 4  ;;  %v1059_v59 = vrot.slane %v2290_v53, 4 }
  0x2f   : > { %v699_v0 = vrot.slane %v2118_v34, 4  ;;  %v528_v7 = vrot.slane %v2149_v45, 4  ;;  %vm1134_vm2 = vcmp.eq.s32.totalorder %v1127_v6, 1  ;;  %v997_v32 = vrot.slane %v965_v51, 4 }
  0x30   : > { %769 = vrot.lane.b32.xlu0 %v763_v63, %s1923_s27  ;;  %v700_v63 = vrot.slane %v2089_v25, 4  ;;  %v842_v25 = vcombine.low %v2061_v14, %v2061_v14  ;;  %v1138_v34 = vsel %vm1134_vm2, %v2063_v15, 0.0  ;;  %v995_v45 = vrot.slane %v2248_v22, 4 }
  0x31   : > { %vm510_vm11 = vcmask 596992   ;;  %vm600_vm1 = vcmask 588800   ;;  %vm683_vm12 = vcmask 580608   ;;  %vm692_vm13 = vcmask 1044024  }
  0x32   : > { %771 = vrot.lane.b32.xlu1 %v764_v62, %s1923_s27  ;;  %v527_v62 = vrot.slane %v2100_v28, 4  ;;  %v529_v28 = vrot.slane %v2146_v44, 4  ;;  %846 = vst [vmem:[#allocation2 + $0x128] sm:$0xf0] %v842_v25  ;;  %v996_v44 = vrot.slane %v2245_v9, 4  ;;  %v1171_v1 = vrot.slane %v2230_v16, 4 }
  0x33   : > { %vm697_vm4 = vcmask 576512   ;;  %vm787_vm5 = vcmask 531460   ;;  %vm826_vm6 = vcmask 523264   ;;  %vm835_vm7 = vcmask 1043968  }
  0x34   : > { %818 = vrot.lane.b32.xlu0 %v2061_v14, %s1924_s28  ;;  %vm905_vm2 = vcmask 1048060  }
  0x36   : > { %820 = vrot.lane.b32.xlu1 %v2075_v20, %s1924_s28  ;;  %v2265_v20 = vsel %vm875_vm0, %v2141_v43, 0.0  ;;  %vm524_vm0 = vcmask 592896  }
  0x37   : > { %v887_v49 = vrot.slane %v2265_v20, 4 }
  0x38   : > { %888 = vrot.lane.b32.xlu0 %v884_v21, %s1925_s29 }
  0x3a   : > { %890 = vrot.lane.b32.xlu1 %v885_v19, %s1925_s29 }
  0x3c   : > { %971 = vrot.lane.b32.xlu0 %v2248_v22, %s1926_s30 }
  0x3e   : > { %973 = vrot.lane.b32.xlu1 %v2245_v9, %s1926_s30 }
  0x40   : > { %1061 = vrot.lane.b32.xlu0 %v1057_v38, %s1927_s11 }
  0x42   : > { %1063 = vrot.lane.b32.xlu1 %v1058_v37, %s1927_s11 }
  0x44   : > { %822 = vrot.lane.b32.xlu0 %v2063_v15, %s1924_s28 }
  0x46   : > { %824 = vrot.lane.b32.xlu1 %v2141_v43, %s1924_s28  ;;  %v1119_v43 = vrot.slane %v2196_v61, %v2035_v8 }
  0x48   : > { %892 = vrot.lane.b32.xlu0 %v886_v50, %s1925_s29  ;;  %vm1132_vm8 = vcmp.eq.s32.totalorder %v1119_v43, 1 }
  0x49   : > { %v2306_v24 = vsel %vm1132_vm8, %v2061_v14, 0.0  ;;  %v843_v14 = vcombine.low %v2063_v15, %v2063_v15  ;;  %vm896_vm8 = vcmask 515072  }
  0x4a   : > { %894 = vrot.lane.b32.xlu1 %v887_v49, %s1925_s29  ;;  %v1168_v3 = vrot.slane %v2306_v24, 4 }
  0x4b   : > { %848 = vst [vmem:[#allocation2 + $0x138] sm:$0xf0] %v843_v14 }
  0x4c   : > { %975 = vrot.lane.b32.xlu0 %v965_v51, %s1926_s30 }
  0x4e   : > { %977 = vrot.lane.b32.xlu1 %v2283_v30, %s1926_s30 }
  0x50   : > { %1065 = vrot.lane.b32.xlu0 %v1059_v59, %s1927_s11 }
  0x52   : > { %1067 = vrot.lane.b32.xlu1 %v1060_v54, %s1927_s11 }
  0x54   : > { %530 = vrot.lane.b32.xlu0 %v526_v60, %s1928_s12 }
  0x56   : > { %532 = vrot.lane.b32.xlu1 %v527_v62, %s1928_s12 }
  0x58   : > { %616 = vrot.lane.b32.xlu0 %v2092_v26, %s1929_s13  ;;  %v702_v26 = vrot.slane %v2182_v55, 4  ;;  %v1169_v55 = vrot.slane %v2219_v11, 4 }
  0x5a   : > { %618 = vrot.lane.b32.xlu1 %v2108_v31, %s1929_s13  ;;  %v701_v31 = vrot.slane %v2185_v56, 4 }
  0x5c   : > { %703 = vrot.lane.b32.xlu0 %v699_v0, %s1930_s14 }
  0x5e   : > { %705 = vrot.lane.b32.xlu1 %v700_v63, %s1930_s14 }
  0x60   : > { %1144 = vrot.lane.b32.xlu0 %v2306_v24, %s1931_s17 }
  0x62   : > { %1146 = vrot.lane.b32.xlu1 %v2219_v11, %s1931_s17 }
  0x64   : > { %534 = vrot.lane.b32.xlu0 %v528_v7, %s1928_s12 }
  0x66   : > { %536 = vrot.lane.b32.xlu1 %v529_v28, %s1928_s12 }
  0x68   : > { %620 = vrot.lane.b32.xlu0 %v2155_v47, %s1929_s13 }
  0x6a   : > { %622 = vrot.lane.b32.xlu1 %v2152_v46, %s1929_s13 }
  0x6c   : > { %707 = vrot.lane.b32.xlu0 %v701_v31, %s1930_s14 }
  0x6e   : > { %709 = vrot.lane.b32.xlu1 %v702_v26, %s1930_s14  ;;  %s1803_s14 = sshll.u32 %s2450_s16, 5 }
  0x70   : > { %1148 = vrot.lane.b32.xlu0 %v1138_v34, %s1931_s17 }
  0x72   : > { %1150 = vrot.lane.b32.xlu1 %v2230_v16, %s1931_s17 }
  0x74   : > { %789 = vrot.lane.b32.xlu0 %v2124_v36, %s1932_s18 }
  0x76   : > { %791 = vrot.lane.b32.xlu1 %v2121_v35, %s1932_s18  ;;  %v998_v35 = vrot.slane %v2283_v30, 4 }
  0x78   : > { %914 = vrot.lane.b32.xlu0 %v2224_v12, %s1933_s8 }
  0x7a   : > { %916 = vrot.lane.b32.xlu1 %v2268_v39, %s1933_s8 }
  0x7c   : > { %1001 = vrot.lane.b32.xlu0 %v996_v44, %s1934_s19 }
  0x7e   : > { %1003 = vrot.lane.b32.xlu1 %v997_v32, %s1934_s19 }
  0x80   : > { %912 = vrot.lane.b32.xlu0 %v2227_v13, %s1933_s8 }
  0x82   : > { %999 = vrot.lane.b32.xlu1 %v995_v45, %s1934_s19 }
  0x84   : > { %793 = vrot.lane.b32.xlu0 %v2191_v58, %s1932_s18  ;;  %v1170_v58 = vrot.slane %v1138_v34, 4 }
  0x86   : > { %795 = vrot.lane.b32.xlu1 %v2188_v57, %s1932_s18  ;;  %v503_v15 = vpop.permute.xlu0 %502 }
  0x87   : > { %520 = vst.msk [vmem:[#allocation2 + $0x8] sm:$0xf] %vm519_vm9, %v503_v15  ;;  %vm979_vm9 = vcmask 465920  }
  0x88   : > { %v2335_v36 = vpop.permute.xlu1 %677  ;;  %918 = vrot.lane.b32.xlu0 %v2265_v20, %s1933_s8  ;;  %s372_s8 = scalar_lea.vmem %s2446_s10, %s1803_s14 }
  0x8a   : > { %1005 = vrot.lane.b32.xlu1 %v998_v35, %s1934_s19  ;;  %v505_v47 = vpop.permute.xlu0 %504  ;;  %s1792_s19 = sshll.u32 %s2450_s16, 2 }
  0x8b   : > { %v511_v56 = vsel %vm510_vm11, %v503_v15, %v505_v47  ;;  %s367_s22 = scalar_lea.vmem %s2445_s9, %s1792_s19 }
  0x8c   : > { %v593_v46 = vpop.permute.xlu1 %592  ;;  %521 = vst [vmem:[#allocation2 + $0x10] sm:$0xf] %v511_v56  ;;  %555 = vst [vmem:[#allocation2 + $0x1b8] sm:$0xf] %v511_v56  ;;  %1087 = vrot.lane.b32.xlu0 %v2251_v23, %s1935_s20 }
  0x8d   : > { %610 = vst.msk [vmem:[#allocation2 + $0x8] sm:$0xf0] %vm609_vm10, %v593_v46  ;;  %vm988_vm10 = vcmask 1043912  }
  0x8e   : > { %1089 = vrot.lane.b32.xlu1 %v2290_v53, %s1935_s20  ;;  %v676_v61 = vpop.permute.xlu0 %675 }
  0x8f   : > { %v684_v10 = vsel %vm683_vm12, %v676_v61, %v2335_v36  ;;  %693 = vst.msk [vmem:[#allocation2 + $0x38] sm:$0xf] %vm692_vm13, %v676_v61  ;;  %vm910_vm13 = vcmask 515076  }
  0x90   : > { %v595_v57 = vpop.permute.xlu1 %594  ;;  %694 = vst [vmem:[#allocation2 + $0x40] sm:$0xf] %v684_v10  ;;  %728 = vst [vmem:[#allocation2 + $0x1e8] sm:$0xf] %v684_v10  ;;  %1174 = vrot.lane.b32.xlu0 %v1169_v55, %s1936_s21 }
  0x91   : > { %v601_v6 = vsel %vm600_vm1, %v593_v46, %v595_v57 }
  0x92   : > { %611 = vst [vmem:[#allocation2 + $0x10] sm:$0xf0] %v601_v6  ;;  %641 = vst [vmem:[#allocation2 + $0x1b8] sm:$0xf0] %v601_v6  ;;  %1176 = vrot.lane.b32.xlu1 %v1170_v58, %s1936_s21  ;;  %v766_v12 = vpop.permute.xlu0 %765 }
  0x93   : > { %783 = vst.msk [vmem:[#allocation2 + $0x38] sm:$0xf0] %vm782_vm15, %v766_v12  ;;  %vm1083_vm15 = vcmask 457732  }
  0x94   : > { %v768_v11 = vpop.permute.xlu1 %767  ;;  %1085 = vrot.lane.b32.xlu0 %v2254_v27, %s1935_s20  ;;  %v1201_v37 = vld [vmem:[#allocation2 + $0x8] sm:$0xff] }
  0x95   : > { %v774_v13 = vsel %vm773_vm14, %v766_v12, %v768_v11 }
  0x96   : > { %784 = vst [vmem:[#allocation2 + $0x40] sm:$0xf0] %v774_v13  ;;  %814 = vst [vmem:[#allocation2 + $0x1e8] sm:$0xf0] %v774_v13  ;;  %1172 = vrot.lane.b32.xlu1 %v1168_v3, %s1936_s21  ;;  %v507_v17 = vpop.permute.xlu0 %506 }
  0x97   : > { %v512_v18 = vsel %vm510_vm11, %v505_v47, %v507_v17 }
  0x98   : > { %v509_v4 = vpop.permute.xlu1 %508  ;;  %522 = vst [vmem:[#allocation2 + $0x18] sm:$0xf] %v512_v18  ;;  %556 = vst [vmem:[#allocation2 + $0x1c0] sm:$0xf] %v512_v18  ;;  %1091 = vrot.lane.b32.xlu0 %v2287_v52, %s1935_s20 }
  0x99   : > { %558 = vst.msk [vmem:[#allocation2 + $0x1d0] sm:$0xf] %vm524_vm0, %v509_v4  ;;  %v513_v19 = vsel %vm510_vm11, %v507_v17, %v509_v4  ;;  %v1202_v27 = vld [vmem:[#allocation2 + $0x10] sm:$0xff]  ;;  %vm1069_vm11 = vcmask 457728   ;;  %vm547_vm0 = vcmask 1047628  }
  0x9a   : > { %523 = vst [vmem:[#allocation2 + $0x20] sm:$0xf] %v513_v19  ;;  %557 = vst [vmem:[#allocation2 + $0x1c8] sm:$0xf] %v513_v19  ;;  %1178 = vrot.lane.b32.xlu1 %v1171_v1, %s1936_s21  ;;  %v597_v21 = vpop.permute.xlu0 %596  ;;  %v1205_v9 = vld [vmem:[#allocation2 + $0x38] sm:$0xff] }
  0x9b   : > { %v602_v22 = vsel %vm600_vm1, %v595_v57, %v597_v21  ;;  %v1820_v38 = vpack.c.bf16 %v1205_v9, %v1201_v37 }
  0x9c   : > { %v599_v16 = vpop.permute.xlu1 %598  ;;  %612 = vst [vmem:[#allocation2 + $0x18] sm:$0xf0] %v602_v22  ;;  %642 = vst [vmem:[#allocation2 + $0x1c0] sm:$0xf0] %v602_v22  ;;  %1261 = vperm.xlu0 %1903, %v1258_v42  }
  0x9d   : > { %644 = vst.msk [vmem:[#allocation2 + $0x1d0] sm:$0xf0] %vm614_vm3, %v599_v16  ;;  %v603_v23 = vsel %vm600_vm1, %v597_v21, %v599_v16  ;;  %v1206_v29 = vld [vmem:[#allocation2 + $0x40] sm:$0xff]  ;;  %vm1078_vm1 = vcmask 1048004   ;;  %vm538_vm3 = vcmask 72704  }
  0x9e   : > { %613 = vst [vmem:[#allocation2 + $0x20] sm:$0xf0] %v603_v23  ;;  %643 = vst [vmem:[#allocation2 + $0x1c8] sm:$0xf0] %v603_v23  ;;  %v1818_v33 = vpack.c.bf16 %v1206_v29, %v1202_v27  ;;  %v680_v39 = vpop.permute.xlu0 %679 }
  0x9f   : > { %v685_v40 = vsel %vm683_vm12, %v2335_v36, %v680_v39 }
  0xa0   : > { %v682_v20 = vpop.permute.xlu1 %681  ;;  %1819 = vmatprep.subr.bf16.mxu0 %v1818_v33  ;;  %695 = vst [vmem:[#allocation2 + $0x48] sm:$0xf] %v685_v40  ;;  %729 = vst [vmem:[#allocation2 + $0x1f0] sm:$0xf] %v685_v40 }
  0xa1   : > { %731 = vst.msk [vmem:[#allocation2 + $0x200] sm:$0xf] %vm697_vm4, %v682_v20  ;;  %v686_v41 = vsel %vm683_vm12, %v680_v39, %v682_v20  ;;  %1821 = vmatpush1.bf16.msra.mxu0 %v1820_v38  ;;  %vm840_vm12 = vcmask 519168   ;;  %vm633_vm4 = vcmask 1043520  }
  0xa2   : > { %696 = vst [vmem:[#allocation2 + $0x50] sm:$0xf] %v686_v41  ;;  %730 = vst [vmem:[#allocation2 + $0x1f8] sm:$0xf] %v686_v41  ;;  %v770_v49 = vpop.permute.xlu0 %769 }
  0xa3   : > { %v775_v50 = vsel %vm773_vm14, %v768_v11, %v770_v49  ;;  %v1203_v63 = vld [vmem:[#allocation2 + $0x18] sm:$0xff] }
  0xa4   : > { %v772_v48 = vpop.permute.xlu1 %771  ;;  %785 = vst [vmem:[#allocation2 + $0x48] sm:$0xf0] %v775_v50  ;;  %815 = vst [vmem:[#allocation2 + $0x1f0] sm:$0xf0] %v775_v50 }
  0xa5   : > { %817 = vst.msk [vmem:[#allocation2 + $0x200] sm:$0xf0] %vm787_vm5, %v772_v48  ;;  %v776_v30 = vsel %vm773_vm14, %v770_v49, %v772_v48  ;;  %v1204_v60 = vld [vmem:[#allocation2 + $0x20] sm:$0xff]  ;;  %vm993_vm14 = vcmask 461824   ;;  %vm624_vm5 = vcmask 64512  }
  0xa6   : > { %786 = vst [vmem:[#allocation2 + $0x50] sm:$0xf0] %v776_v30  ;;  %816 = vst [vmem:[#allocation2 + $0x1f8] sm:$0xf0] %v776_v30  ;;  %v819_v52 = vpop.permute.xlu0 %818 }
  0xa7   : > { %836 = vst.msk [vmem:[#allocation2 + $0x68] sm:$0xf] %vm835_vm7, %v819_v52  ;;  %vm711_vm7 = vcmask 56320  }
  0xa8   : > { %v821_v51 = vpop.permute.xlu1 %820 }
  0xa9   : > { %v827_v53 = vsel %vm826_vm6, %v819_v52, %v821_v51 }
  0xaa   : > { %837 = vst [vmem:[#allocation2 + $0x70] sm:$0xf] %v827_v53  ;;  %851 = vst [vmem:[#allocation2 + $0x218] sm:$0xf] %v827_v53  ;;  %v889_v59 = vpop.permute.xlu0 %888 }
  0xab   : > { %906 = vst.msk [vmem:[#allocation2 + $0x68] sm:$0xf0] %vm905_vm2, %v889_v59  ;;  %v1207_v0 = vld [vmem:[#allocation2 + $0x48] sm:$0xff]  ;;  %vm1152_vm2 = vcmask 449536  }
  0xac   : > { %v891_v54 = vpop.permute.xlu1 %890  ;;  %v1848_v28 = vpack.c.bf16 %v1207_v0, %v1203_v63 }
  0xad   : > { %v897_v62 = vsel %vm896_vm8, %v889_v59, %v891_v54  ;;  %v1208_v43 = vld [vmem:[#allocation2 + $0x50] sm:$0xff] }
  0xae   : > { %907 = vst [vmem:[#allocation2 + $0x70] sm:$0xf0] %v897_v62  ;;  %937 = vst [vmem:[#allocation2 + $0x218] sm:$0xf0] %v897_v62  ;;  %v1846_v24 = vpack.c.bf16 %v1208_v43, %v1204_v60  ;;  %v972_v25 = vpop.permute.xlu0 %971 }
  0xaf   : > { %989 = vst.msk [vmem:[#allocation2 + $0x98] sm:$0xf] %vm988_vm10, %v972_v25  ;;  %vm806_vm10 = vcmask 1043464  }
  0xb0   : > { %v974_v7 = vpop.permute.xlu1 %973  ;;  %1847 = vmatprep.subr.bf16.mxu1 %v1846_v24 }
  0xb1   : > { %v980_v26 = vsel %vm979_vm9, %v972_v25, %v974_v7  ;;  %1849 = vmatpush1.bf16.msra.mxu1 %v1848_v28 }
  0xb2   : > { %990 = vst [vmem:[#allocation2 + $0xa0] sm:$0xf] %v980_v26  ;;  %1024 = vst [vmem:[#allocation2 + $0x248] sm:$0xf] %v980_v26  ;;  %v1062_v34 = vpop.permute.xlu0 %1061  ;;  %v1209_v61 = vld [vmem:[#allocation2 + $0x68] sm:$0xff] }
  0xb3   : > { %1079 = vst.msk [vmem:[#allocation2 + $0x98] sm:$0xf0] %vm1078_vm1, %v1062_v34  ;;  %vm920_vm1 = vcmask 1039360  }
  0xb4   : > { %v1064_v31 = vpop.permute.xlu1 %1063 }
  0xb5   : > { %v1070_v14 = vsel %vm1069_vm11, %v1062_v34, %v1064_v31  ;;  %v1210_v56 = vld [vmem:[#allocation2 + $0x70] sm:$0xff] }
  0xb6   : > { %1080 = vst [vmem:[#allocation2 + $0xa0] sm:$0xf0] %v1070_v14  ;;  %1110 = vst [vmem:[#allocation2 + $0x248] sm:$0xf0] %v1070_v14  ;;  %v823_v32 = vpop.permute.xlu0 %822 }
  0xb7   : > { %v828_v45 = vsel %vm826_vm6, %v821_v51, %v823_v32 }
  0xb8   : > { %v825_v44 = vpop.permute.xlu1 %824  ;;  %838 = vst [vmem:[#allocation2 + $0x78] sm:$0xf] %v828_v45  ;;  %852 = vst [vmem:[#allocation2 + $0x220] sm:$0xf] %v828_v45 }
  0xb9   : > { %854 = vst.msk [vmem:[#allocation2 + $0x230] sm:$0xf] %vm840_vm12, %v825_v44  ;;  %v829_v35 = vsel %vm826_vm6, %v823_v32, %v825_v44  ;;  %vm720_vm6 = vcmask 1047612   ;;  %vm1007_vm12 = vcmask 990208  }
  0xba   : > { %839 = vst [vmem:[#allocation2 + $0x80] sm:$0xf] %v829_v35  ;;  %853 = vst [vmem:[#allocation2 + $0x228] sm:$0xf] %v829_v35  ;;  %v893_v36 = vpop.permute.xlu0 %892  ;;  %v1213_v46 = vld [vmem:[#allocation2 + $0x98] sm:$0xff] }
  0xbb   : > { %v898_v47 = vsel %vm896_vm8, %v891_v54, %v893_v36  ;;  %v1824_v6 = vpack.c.bf16 %v1213_v46, %v1209_v61 }
  0xbc   : > { %v895_v15 = vpop.permute.xlu1 %894  ;;  %908 = vst [vmem:[#allocation2 + $0x78] sm:$0xf0] %v898_v47  ;;  %938 = vst [vmem:[#allocation2 + $0x220] sm:$0xf0] %v898_v47 }
  0xbd   : > { %940 = vst.msk [vmem:[#allocation2 + $0x230] sm:$0xf0] %vm910_vm13, %v895_v15  ;;  %v899_v55 = vsel %vm896_vm8, %v893_v36, %v895_v15  ;;  %v1214_v58 = vld [vmem:[#allocation2 + $0xa0] sm:$0xff]  ;;  %vm1161_vm8 = vcmask 1043896   ;;  %vm934_vm13 = vcmask 1035264  }
  0xbe   : > { %909 = vst [vmem:[#allocation2 + $0x80] sm:$0xf0] %v899_v55  ;;  %939 = vst [vmem:[#allocation2 + $0x228] sm:$0xf0] %v899_v55  ;;  %v1822_v57 = vpack.c.bf16 %v1214_v58, %v1210_v56  ;;  %v976_v3 = vpop.permute.xlu0 %975 }
  0xbf   : > { %v981_v11 = vsel %vm979_vm9, %v974_v7, %v976_v3 }
  0xc0   : > { %v978_v10 = vpop.permute.xlu1 %977  ;;  %1823 = vmatprep.subr.bf16.mxu0 %v1822_v57  ;;  %991 = vst [vmem:[#allocation2 + $0xa8] sm:$0xf] %v981_v11  ;;  %1025 = vst [vmem:[#allocation2 + $0x250] sm:$0xf] %v981_v11 }
  0xc1   : > { %1027 = vst.msk [vmem:[#allocation2 + $0x260] sm:$0xf] %vm993_vm14, %v978_v10  ;;  %v982_v12 = vsel %vm979_vm9, %v976_v3, %v978_v10  ;;  %1825 = vmatpush1.bf16.msra.mxu0 %v1824_v6  ;;  %vm1166_vm9 = vcmask 445440   ;;  %vm1021_vm14 = vcmask 990212  }
  0xc2   : > { %992 = vst [vmem:[#allocation2 + $0xb0] sm:$0xf] %v982_v12  ;;  %1026 = vst [vmem:[#allocation2 + $0x258] sm:$0xf] %v982_v12  ;;  %v1066_v1 = vpop.permute.xlu0 %1065 }
  0xc3   : > { %v1071_v4 = vsel %vm1069_vm11, %v1064_v31, %v1066_v1  ;;  %v1211_v29 = vld [vmem:[#allocation2 + $0x78] sm:$0xff] }
  0xc4   : > { %v1068_v13 = vpop.permute.xlu1 %1067  ;;  %1081 = vst [vmem:[#allocation2 + $0xa8] sm:$0xf0] %v1071_v4  ;;  %1111 = vst [vmem:[#allocation2 + $0x250] sm:$0xf0] %v1071_v4 }
  0xc5   : > { %1113 = vst.msk [vmem:[#allocation2 + $0x260] sm:$0xf0] %vm1083_vm15, %v1068_v13  ;;  %v1072_v17 = vsel %vm1069_vm11, %v1066_v1, %v1068_v13  ;;  %v1212_v22 = vld [vmem:[#allocation2 + $0x80] sm:$0xff]  ;;  %vm797_vm11 = vcmask 7168   ;;  %vm1093_vm15 = vcmask 982016  }
  0xc6   : > { %1082 = vst [vmem:[#allocation2 + $0xb0] sm:$0xf0] %v1072_v17  ;;  %1112 = vst [vmem:[#allocation2 + $0x258] sm:$0xf0] %v1072_v17  ;;  %v531_v18 = vpop.permute.xlu0 %530 }
  0xc7   : > { %548 = vst.msk [vmem:[#allocation2 + $0xc8] sm:$0xf0] %vm547_vm0, %v531_v18  ;;  %vm1180_vm0 = vcmask 973824  }
  0xc8   : > { %v533_v19 = vpop.permute.xlu1 %532 }
  0xc9   : > { %v539_v16 = vsel %vm538_vm3, %v531_v18, %v533_v19 }
  0xca   : > { %549 = vst [vmem:[#allocation2 + $0xd0] sm:$0xf0] %v539_v16  ;;  %v617_v21 = vpop.permute.xlu0 %616 }
  0xcb   : > { %634 = vst.msk [vmem:[#allocation2 + $0xf8] sm:$0xf] %vm633_vm4, %v617_v21  ;;  %v1215_v33 = vld [vmem:[#allocation2 + $0xa8] sm:$0xff]  ;;  %vm1194_vm4 = vcmask 973828  }
  0xcc   : > { %v619_v9 = vpop.permute.xlu1 %618  ;;  %v1852_v38 = vpack.c.bf16 %v1215_v33, %v1211_v29 }
  0xcd   : > { %v625_v23 = vsel %vm624_vm5, %v617_v21, %v619_v9  ;;  %v1216_v27 = vld [vmem:[#allocation2 + $0xb0] sm:$0xff] }
  0xce   : > { %635 = vst [vmem:[#allocation2 + $0x100] sm:$0xf] %v625_v23  ;;  %v1850_v37 = vpack.c.bf16 %v1216_v27, %v1212_v22  ;;  %v704_v20 = vpop.permute.xlu0 %703 }
  0xcf   : > { %721 = vst.msk [vmem:[#allocation2 + $0xf8] sm:$0xf0] %vm720_vm6, %v704_v20  ;;  %vm1264_vm6 = vcmask 916480  }
  0xd0   : > { %1851 = vmatprep.subr.bf16.mxu1 %v1850_v37  ;;  %v706_v39 = vpop.permute.xlu1 %705 }
  0xd1   : > { %v712_v40 = vsel %vm711_vm7, %v704_v20, %v706_v39  ;;  %1853 = vmatpush1.bf16.msra.mxu1 %v1852_v38 }
  0xd2   : > { %722 = vst [vmem:[#allocation2 + $0x100] sm:$0xf0] %v712_v40  ;;  %v1145_v41 = vpop.permute.xlu0 %1144 }
  0xd3   : > { %1162 = vst.msk [vmem:[#allocation2 + $0xc8] sm:$0xf] %vm1161_vm8, %v1145_v41 }
  0xd4   : > { %v1147_v42 = vpop.permute.xlu1 %1146 }
  0xd5   : > { %v1153_v48 = vsel %vm1152_vm2, %v1145_v41, %v1147_v42 }
  0xd6   : > { %1163 = vst [vmem:[#allocation2 + $0xd0] sm:$0xf] %v1153_v48  ;;  %1197 = vst [vmem:[#allocation2 + $0x278] sm:$0xf] %v1153_v48  ;;  %v535_v49 = vpop.permute.xlu0 %534  ;;  %v1221_v0 = vld [vmem:[#allocation2 + $0xf8] sm:$0xff] }
  0xd7   : > { %v540_v30 = vsel %vm538_vm3, %v533_v19, %v535_v49 }
  0xd8   : > { %v537_v50 = vpop.permute.xlu1 %536  ;;  %550 = vst [vmem:[#allocation2 + $0xd8] sm:$0xf0] %v540_v30 }
  0xd9   : > { %v541_v51 = vsel %vm538_vm3, %v535_v49, %v537_v50  ;;  %v1222_v43 = vld [vmem:[#allocation2 + $0x100] sm:$0xff]  ;;  %vm1107_vm3 = vcmask 977920  }
  0xda   : > { %551 = vst [vmem:[#allocation2 + $0xe0] sm:$0xf0] %v541_v51  ;;  %v621_v52 = vpop.permute.xlu0 %620  ;;  %v1217_v54 = vld [vmem:[#allocation2 + $0xc8] sm:$0xff] }
  0xdb   : > { %v626_v59 = vsel %vm624_vm5, %v619_v9, %v621_v52  ;;  %v1828_v24 = vpack.c.bf16 %v1221_v0, %v1217_v54 }
  0xdc   : > { %v623_v53 = vpop.permute.xlu1 %622  ;;  %636 = vst [vmem:[#allocation2 + $0x108] sm:$0xf] %v626_v59 }
  0xdd   : > { %v627_v60 = vsel %vm624_vm5, %v621_v52, %v623_v53  ;;  %v1218_v62 = vld [vmem:[#allocation2 + $0xd0] sm:$0xff] }
  0xde   : > { %637 = vst [vmem:[#allocation2 + $0x110] sm:$0xf] %v627_v60  ;;  %v1826_v63 = vpack.c.bf16 %v1222_v43, %v1218_v62  ;;  %v708_v28 = vpop.permute.xlu0 %707 }
  0xdf   : > { %v713_v25 = vsel %vm711_vm7, %v706_v39, %v708_v28 }
  0xe0   : > { %1827 = vmatprep.subr.bf16.mxu0 %v1826_v63  ;;  %v710_v7 = vpop.permute.xlu1 %709  ;;  %723 = vst [vmem:[#allocation2 + $0x108] sm:$0xf0] %v713_v25 }
  0xe1   : > { %v714_v26 = vsel %vm711_vm7, %v708_v28, %v710_v7  ;;  %1829 = vmatpush1.bf16.msra.mxu0 %v1828_v24  ;;  %v1238_v7 = vld [vmem:[#allocation2 + $0x1c0] sm:$0xff]  ;;  %vm1937_vm7 = vmmov 0  }
  0xe2   : > { %724 = vst [vmem:[#allocation2 + $0x110] sm:$0xf0] %v714_v26  ;;  %v1149_v31 = vpop.permute.xlu0 %1148  ;;  %v1246_v26 = vld [vmem:[#allocation2 + $0x220] sm:$0xff] }
  0xe3   : > { %v1154_v14 = vsel %vm1152_vm2, %v1147_v42, %v1149_v31 }
  0xe4   : > { %v1151_v34 = vpop.permute.xlu1 %1150  ;;  %1164 = vst [vmem:[#allocation2 + $0xd8] sm:$0xf] %v1154_v14  ;;  %1198 = vst [vmem:[#allocation2 + $0x280] sm:$0xf] %v1154_v14 }
  0xe5   : > { %v1155_v44 = vsel %vm1152_vm2, %v1149_v31, %v1151_v34  ;;  %1200 = vst.msk [vmem:[#allocation2 + $0x290] sm:$0xf] %vm1166_vm9, %v1151_v34  ;;  %v1237_v34 = vld [vmem:[#allocation2 + $0x1b8] sm:$0xff] }
  0xe6   : > { %1165 = vst [vmem:[#allocation2 + $0xe0] sm:$0xf] %v1155_v44  ;;  %1199 = vst [vmem:[#allocation2 + $0x288] sm:$0xf] %v1155_v44  ;;  %v790_v32 = vpop.permute.xlu0 %789  ;;  %v1242_v44 = vld [vmem:[#allocation2 + $0x1f0] sm:$0xff] }
  0xe7   : > { %807 = vst.msk [vmem:[#allocation2 + $0x128] sm:$0xf] %vm806_vm10, %v790_v32  ;;  %v1223_v58 = vld [vmem:[#allocation2 + $0x108] sm:$0xff] }
  0xe8   : > { %v792_v45 = vpop.permute.xlu1 %791 }
  0xe9   : > { %v798_v35 = vsel %vm797_vm11, %v790_v32, %v792_v45  ;;  %v1224_v46 = vld [vmem:[#allocation2 + $0x110] sm:$0xff]  ;;  %v1838_v32 = vpack.c.bf16 %v1246_v26, %v1242_v44 }
  0xea   : > { %808 = vst [vmem:[#allocation2 + $0x130] sm:$0xf] %v798_v35  ;;  %v915_v15 = vpop.permute.xlu0 %914  ;;  %v1245_v35 = vld [vmem:[#allocation2 + $0x218] sm:$0xff] }
  0xeb   : > { %v1219_v56 = vld [vmem:[#allocation2 + $0xd8] sm:$0xff] }
  0xec   : > { %v917_v36 = vpop.permute.xlu1 %916  ;;  %v1856_v61 = vpack.c.bf16 %v1223_v58, %v1219_v56  ;;  %v1239_v58 = vld [vmem:[#allocation2 + $0x1c8] sm:$0xff] }
  0xed   : > { %v922_v47 = vsel %vm920_vm1, %v915_v15, %v917_v36  ;;  %v1220_v55 = vld [vmem:[#allocation2 + $0xe0] sm:$0xff] }
  0xee   : > { %932 = vst [vmem:[#allocation2 + $0x160] sm:$0xf] %v922_v47  ;;  %v1854_v57 = vpack.c.bf16 %v1224_v46, %v1220_v55  ;;  %v1002_v6 = vpop.permute.xlu0 %1001  ;;  %v1225_v33 = vld [vmem:[#allocation2 + $0x128] sm:$0xff]  ;;  %v1248_v46 = vld [vmem:[#allocation2 + $0x230] sm:$0xff] }
  0xef   : > { %v1241_v55 = vld [vmem:[#allocation2 + $0x1e8] sm:$0xff] }
  0xf0   : > { %1855 = vmatprep.subr.bf16.mxu1 %v1854_v57  ;;  %v1004_v10 = vpop.permute.xlu1 %1003  ;;  %v1840_v57 = vpack.c.bf16 %v1245_v35, %v1241_v55 }
  0xf1   : > { %v1009_v3 = vsel %vm1007_vm12, %v1002_v6, %v1004_v10  ;;  %1857 = vmatpush1.bf16.msra.mxu1 %v1856_v61  ;;  %v1226_v16 = vld [vmem:[#allocation2 + $0x130] sm:$0xff] }
  0xf2   : > { %1019 = vst [vmem:[#allocation2 + $0x160] sm:$0xf0] %v1009_v3  ;;  %v913_v11 = vpop.permute.xlu0 %912 }
  0xf3   : > { %v921_v13 = vsel %vm920_vm1, %v913_v11, %v915_v15 }
  0xf4   : > { %v1000_v12 = vpop.permute.xlu1 %999  ;;  %931 = vst [vmem:[#allocation2 + $0x158] sm:$0xf] %v921_v13  ;;  %v1247_v13 = vld [vmem:[#allocation2 + $0x228] sm:$0xff] }
  0xf5   : > { %v1008_v1 = vsel %vm1007_vm12, %v1000_v12, %v1002_v6  ;;  %v1250_v6 = vld [vmem:[#allocation2 + $0x250] sm:$0xff]  ;;  %v1253_v12 = vld [vmem:[#allocation2 + $0x278] sm:$0xff] }
  0xf6   : > { %1018 = vst [vmem:[#allocation2 + $0x158] sm:$0xf0] %v1008_v1  ;;  %v794_v4 = vpop.permute.xlu0 %793  ;;  %v1256_v1 = vld [vmem:[#allocation2 + $0x290] sm:$0xff] }
  0xf7   : > { %v799_v18 = vsel %vm797_vm11, %v792_v45, %v794_v4  ;;  %v1240_v45 = vld [vmem:[#allocation2 + $0x1d0] sm:$0xff] }
  0xf8   : > { %v796_v17 = vpop.permute.xlu1 %795  ;;  %809 = vst [vmem:[#allocation2 + $0x138] sm:$0xf] %v799_v18 }
  0xf9   : > { %v800_v19 = vsel %vm797_vm11, %v794_v4, %v796_v17  ;;  %v1230_v21 = vld [vmem:[#allocation2 + $0x160] sm:$0xff]  ;;  %v1249_v4 = vld [vmem:[#allocation2 + $0x248] sm:$0xff]  ;;  %v1243_v17 = vld [vmem:[#allocation2 + $0x1f8] sm:$0xff] }
  0xfa   : > { %810 = vst [vmem:[#allocation2 + $0x140] sm:$0xf] %v800_v19  ;;  %v1830_v9 = vpack.c.bf16 %v1230_v21, %v1226_v16  ;;  %v919_v22 = vpop.permute.xlu0 %918  ;;  %v1844_v18 = vpack.c.bf16 %v1253_v12, %v1249_v4  ;;  %v1868_v19 = vpack.c.bf16 %v1247_v13, %v1243_v17  ;;  %v1252_v16 = vld [vmem:[#allocation2 + $0x260] sm:$0xff] }
  0xfb   : > { %v923_v27 = vsel %vm920_vm1, %v917_v36, %v919_v22  ;;  %935 = vst.msk [vmem:[#allocation2 + $0x170] sm:$0xf] %vm934_vm13, %v919_v22  ;;  %v1254_v36 = vld [vmem:[#allocation2 + $0x280] sm:$0xff]  ;;  %v1870_v21 = vpack.c.bf16 %v1256_v1, %v1252_v16 }
  0xfc   : > { %1831 = vmatprep.subr.bf16.mxu0 %v1830_v9  ;;  %v1006_v23 = vpop.permute.xlu1 %1005  ;;  %933 = vst [vmem:[#allocation2 + $0x168] sm:$0xf] %v923_v27  ;;  %v1842_v3 = vpack.c.bf16 %v1254_v36, %v1250_v6  ;;  %v1255_v9 = vld [vmem:[#allocation2 + $0x288] sm:$0xff]  ;;  %v1257_v22 = vld [vmem:[%s2438_s2] sm:$0xff] }
  0xfd   : > { %v1010_v29 = vsel %vm1007_vm12, %v1004_v10, %v1006_v23  ;;  %1022 = vst.msk [vmem:[#allocation2 + $0x170] sm:$0xf0] %vm1021_vm14, %v1006_v23  ;;  %v1229_v37 = vld [vmem:[#allocation2 + $0x158] sm:$0xff]  ;;  %v1244_v10 = vld [vmem:[#allocation2 + $0x200] sm:$0xff] }
  0xfe   : > { %1020 = vst [vmem:[#allocation2 + $0x168] sm:$0xf0] %v1010_v29  ;;  %v1832_v38 = vpack.c.bf16 %v1229_v37, %v1225_v33  ;;  %v1088_v20 = vpop.permute.xlu0 %1087  ;;  %v1866_v11 = vpack.c.bf16 %v1248_v46, %v1244_v10  ;;  %v1251_v23 = vld [vmem:[#allocation2 + $0x258] sm:$0xff]  ;;  %v1909_v27 = vld [vmem:[#allocation2] sm:$0xff] }
  0xff   : > { %v1227_v51 = vld [vmem:[#allocation2 + $0x138] sm:$0xff]  ;;  %v1872_v29 = vpack.c.bf16 %v1255_v9, %v1251_v23  ;;  %v1599_v36 = vld [vmem:[%s2441_s5] sm:$0xff] }
 0x100   : > { %1833 = vmatpush1.bf16.msra.mxu0 %v1832_v38  ;;  %v1090_v39 = vpop.permute.xlu1 %1089  ;;  %v1617_v46 = vld [vmem:[%s2443_s7] sm:$0xff] }
 0x101   : > { %v1095_v40 = vsel %vm1093_vm15, %v1088_v20, %v1090_v39  ;;  %v1228_v48 = vld [vmem:[#allocation2 + $0x140] sm:$0xff] }
 0x102   : > { %1105 = vst [vmem:[#allocation2 + $0x190] sm:$0xf] %v1095_v40  ;;  %v1175_v41 = vpop.permute.xlu0 %1174 }
 0x104   : > { %v1177_v42 = vpop.permute.xlu1 %1176  ;;  %v1232_v49 = vld [vmem:[#allocation2 + $0x170] sm:$0xff] }
 0x105   : > { %v1182_v50 = vsel %vm1180_vm0, %v1175_v41, %v1177_v42  ;;  %v1858_v30 = vpack.c.bf16 %v1232_v49, %v1228_v48  ;;  %v1231_v52 = vld [vmem:[#allocation2 + $0x168] sm:$0xff] }
 0x106   : > { %1192 = vst [vmem:[#allocation2 + $0x190] sm:$0xf0] %v1182_v50  ;;  %v1860_v53 = vpack.c.bf16 %v1231_v52, %v1227_v51  ;;  %v1086_v54 = vpop.permute.xlu0 %1085  ;;  %v1415_v51 = vld [vmem:[%s2442_s6] sm:$0xff] }
 0x107   : > { %1859 = vmatprep.subr.bf16.mxu1 %v1858_v30  ;;  %v1094_v60 = vsel %vm1093_vm15, %v1086_v54, %v1088_v20 }
 0x108   : > { %1861 = vmatpush1.bf16.msra.mxu1 %v1860_v53  ;;  %v1173_v59 = vpop.permute.xlu1 %1172  ;;  %1104 = vst [vmem:[#allocation2 + $0x188] sm:$0xf] %v1094_v60 }
 0x109   : > { %v1181_v62 = vsel %vm1180_vm0, %v1173_v59, %v1175_v41 }
 0x10a   : > { %1191 = vst [vmem:[#allocation2 + $0x188] sm:$0xf0] %v1181_v62  ;;  %v1092_v43 = vpop.permute.xlu0 %1091 }
 0x10b   : > { %v1096_v0 = vsel %vm1093_vm15, %v1090_v39, %v1092_v43  ;;  %1108 = vst.msk [vmem:[#allocation2 + $0x1a0] sm:$0xf] %vm1107_vm3, %v1092_v43 }
 0x10c   : > { %v1179_v63 = vpop.permute.xlu1 %1178  ;;  %1106 = vst [vmem:[#allocation2 + $0x198] sm:$0xf] %v1096_v0 }
 0x10d   : > { %v1183_v24 = vsel %vm1180_vm0, %v1177_v42, %v1179_v63  ;;  %1195 = vst.msk [vmem:[#allocation2 + $0x1a0] sm:$0xf0] %vm1194_vm4, %v1179_v63  ;;  %v1234_v28 = vld [vmem:[#allocation2 + $0x190] sm:$0xff] }
 0x10e   : > { %1193 = vst [vmem:[#allocation2 + $0x198] sm:$0xf0] %v1183_v24  ;;  %v1834_v25 = vpack.c.bf16 %v1238_v7, %v1234_v28 }
 0x110   : > { %1835 = vmatprep.subr.bf16.mxu0 %v1834_v25 }
 0x111   : > { %v1233_v31 = vld [vmem:[#allocation2 + $0x188] sm:$0xff] }
 0x112   : > { %v1836_v14 = vpack.c.bf16 %v1237_v34, %v1233_v31  ;;  %v1589_v34 = vld [vmem:[%s2440_s4] sm:$0xff] }
 0x114   : > { %1837 = vmatpush1.bf16.msra.mxu0 %v1836_v14  ;;  %v1236_v15 = vld [vmem:[#allocation2 + $0x1a0] sm:$0xff] }
 0x115   : > { %1839 = vmatprep.subr.bf16.mxu0 %v1838_v32  ;;  %v1862_v47 = vpack.c.bf16 %v1240_v45, %v1236_v15  ;;  %v1235_v56 = vld [vmem:[#allocation2 + $0x198] sm:$0xff] }
 0x116   : > { %v1864_v61 = vpack.c.bf16 %v1239_v58, %v1235_v56 }
 0x117   : > { %1863 = vmatprep.subr.bf16.mxu1 %v1862_v47  ;;  %v1651_v47 = vld [vmem:[#allocation3] sm:$0x1] }
 0x118   : > { %1841 = vmatpush1.bf16.msra.mxu0 %v1840_v57  ;;  %1865 = vmatpush1.bf16.msra.mxu1 %v1864_v61 }
 0x119   : > { %1843 = vmatprep.subr.bf16.mxu0 %v1842_v3  ;;  %1867 = vmatprep.subr.bf16.mxu1 %v1866_v11 }
 0x11b   : > { %v1262_v33 = vpop.permute.xlu0 %1261 }
 0x11c   : > { %1845 = vmatpush1.bf16.msra.mxu0 %v1844_v18  ;;  %1869 = vmatpush1.bf16.msra.mxu1 %v1868_v19 }
 0x11d   : > { %1871 = vmatprep.subr.bf16.mxu1 %v1870_v21  ;;  %1808 = vmatprep.subr.mxu0 %v1909_v27 }
 0x11f   : > { %1796 = vmatmul.mubr.msk.f32.vlgmr.msra.gmra.mrb[0].mxu0 %vm1264_vm6, %v1257_v22 }
 0x120   : > { %1873 = vmatpush1.bf16.msra.mxu1 %v1872_v29  ;;  %1810 = vmatprep.mubr.msk.f32.mxu0 %vm1937_vm7, %v1909_v27 }
 0x121   : > { %1813 = vmatprep.subr.mxu1 %v1909_v27 }
 0x123   : > { %1797 = vmatmul.mubr.msk.f32.vlgmr.msra.gmra.mrb[0].mxu1 %vm1264_vm6, %v1257_v22 }
 0x124   : > { %1815 = vmatprep.mubr.msk.f32.mxu1 %vm1937_vm7, %v1909_v27 }
 0x1f2   : > { %v1334_v37 = vpop.f32.mrb[0].mxu0 }
 0x1f3   : > { %v1335_v38 = vadd.f32 %v1334_v37, %v1262_v33  ;;  %v1336_v20 = vpop.f32.mrb[1].mxu0 }
 0x1f4   : > { %v1337_v39 = vadd.f32 %v1336_v20, %v1262_v33 }
 0x1f6   : > { %v1410_v40 = vadd.f32 %v1337_v39, %v1335_v38  ;;  %v1405_v41 = vpop.f32.mrb[0].mxu1 }
 0x1f7   : > { %v1406_v42 = vadd.f32 %v1405_v41, %v1262_v33  ;;  %v1407_v48 = vpop.f32.mrb[1].mxu1 }
 0x1f8   : > { %v1408_v49 = vadd.f32 %v1407_v48, %v1262_v33 }
 0x1f9   : > { %v1411_v50 = vadd.f32 %v1410_v40, %v1406_v42 }
 0x1fb   : > { %v1412_v30 = vadd.f32 %v1411_v50, %v1408_v49 }
 0x1fd   : > { %1413 = vadd.xlane.f32.xlu1 %v1412_v30 }
 0x28a   : > { %v1414_v52 = vpop.xlane.xlu1 %1413 }
 0x28b   : > { %1809 = vmatpush3.msra.mxu0 %v1414_v52 }
 0x28c   : > { %1811 = vmatmul.mubr.msk.f32.vlgmr.msra.gmra.mrb[2].mxu0 %vm624_vm5, %v1415_v51 }
 0x35f   : > { %v1485_v53 = vpop.f32.mrb[2].mxu0 }
 0x360   : > { %1491 = vperm.xlu0 %1903, %v1485_v53   ;;  %v1812_v54 = vpop.f32.mrb[3].mxu0 }
 0x3df   : > { %v1492_v59 = vpop.permute.xlu0 %1491 }
 0x3e0   : > { %v1494_v60 = vsub.f32 %v1335_v38, %v1492_v59  ;;  %v1495_v62 = vsub.f32 %v1337_v39, %v1492_v59  ;;  %v1496_v43 = vsub.f32 %v1406_v42, %v1492_v59  ;;  %v1497_v63 = vsub.f32 %v1408_v49, %v1492_v59 }
 0x3e1   : > { %v1938_v49 = vmov 1966171168  }
 0x3e2   : > { %v1498_v0 = vmul.f32 %v1494_v60, %v1494_v60  ;;  %v1499_v24 = vmul.f32 %v1495_v62, %v1495_v62  ;;  %v1500_v28 = vmul.f32 %v1496_v43, %v1496_v43  ;;  %v1501_v25 = vmul.f32 %v1497_v63, %v1497_v63 }
 0x3e3   : > { %v1672_v50 = vunpack.c.l.s4 %v1938_v49 }
 0x3e4   : > { %v1502_v7 = vadd.f32 %v1499_v24, %v1498_v0 }
 0x3e6   : > { %v1503_v26 = vadd.f32 %v1502_v7, %v1500_v28 }
 0x3e8   : > { %v1504_v31 = vadd.f32 %v1503_v26, %v1501_v25 }
 0x3ea   : > { %1505 = vadd.xlane.f32.xlu0 %v1504_v31 }
 0x400   : > { %1592 = vperm.xlu0 %1903, %v1589_v34  }
 0x477   : > { %v1506_v14 = vpop.xlane.xlu0 %1505 }
 0x478   : > { %1814 = vmatpush3.msra.mxu1 %v1506_v14 }
 0x479   : > { %1816 = vmatmul.mubr.msk.f32.vlgmr.msra.gmra.mrb[2].mxu1 %vm624_vm5, %v1415_v51  ;;  %vm1696_vm5 = vcmp.lt.s32.totalorder %v468_v2, 512 }
 0x47f   : > { %v1593_v6 = vpop.permute.xlu0 %1592 }
 0x54c   : > { %v1573_v44 = vpop.f32.mrb[2].mxu1 }
 0x54d   : > { %v1577_v32 = vmax.f32 %v1573_v44, 0.0  ;;  %v1817_v45 = vpop.f32.mrb[3].mxu1 }
 0x54f   : > { %v1578_v35 = vadd.f32 1e-05, %v1577_v32 }
 0x551   : > { %1907 = vrsqrt.f32 %v1578_v35 }
 0x55b   : > { %v1908_v15 = vpop.eup %1907 }
 0x55c   : > { %1582 = vperm.xlu1 %1904, %v1908_v15  }
 0x560   : > { %1602 = vperm.xlu1 %1904, %v1599_v36  }
 0x564   : > { %1620 = vperm.xlu1 %1904, %v1617_v46  }
 0x568   : > { %1654 = vperm.xlu1 %1904, %v1651_v47  }
 0x5db   : > { %v1583_v55 = vpop.permute.xlu1 %1582 }
 0x5dc   : > { %v1585_v56 = vmul.f32 %v1583_v55, %v1494_v60  ;;  %v1586_v58 = vmul.f32 %v1583_v55, %v1495_v62  ;;  %v1587_v57 = vmul.f32 %v1583_v55, %v1496_v43  ;;  %v1588_v61 = vmul.f32 %v1583_v55, %v1497_v63 }
 0x5dd   : > { %v1673_v63 = vunpack.c.0.s8 %v1672_v50 }
 0x5de   : > { %v1595_v10 = vmul.f32 %v1593_v6, %v1585_v56  ;;  %v1596_v3 = vmul.f32 %v1593_v6, %v1586_v58  ;;  %v1597_v11 = vmul.f32 %v1593_v6, %v1587_v57  ;;  %v1598_v12 = vmul.f32 %v1593_v6, %v1588_v61 }
 0x5df   : > { %v1603_v13 = vpop.permute.xlu1 %1602  ;;  %v1676_v44 = vsub.s32 %v1673_v63, %v2022_v5 }
 0x5e0   : > { %v1605_v1 = vadd.f32 %v1603_v13, %v1595_v10  ;;  %v1606_v4 = vadd.f32 %v1603_v13, %v1596_v3  ;;  %v1607_v17 = vadd.f32 %v1603_v13, %v1597_v11  ;;  %v1608_v18 = vadd.f32 %v1603_v13, %v1598_v12 }
 0x5e2   : > { %v1609_v19 = vmax.f32 %v1605_v1, 0.0  ;;  %v1610_v16 = vmax.f32 %v1606_v4, 0.0  ;;  %v1611_v21 = vmax.f32 %v1607_v17, 0.0  ;;  %v1612_v9 = vmax.f32 %v1608_v18, 0.0 }
 0x5e3   : > { %v1621_v22 = vpop.permute.xlu1 %1620 }
 0x5e4   : > { %1613 = vst [vmem:[%s372_s8] sm:$0xff] %v1609_v19  ;;  %1614 = vst [vmem:[%s372_s8 + $0x8] sm:$0xff] %v1610_v16  ;;  %v1623_v23 = vmul.f32 %v1621_v22, %v1609_v19  ;;  %v1624_v27 = vmul.f32 %v1621_v22, %v1610_v16  ;;  %v1625_v29 = vmul.f32 %v1621_v22, %v1611_v21 }
 0x5e5   : > { %1615 = vst [vmem:[%s372_s8 + $0x10] sm:$0xff] %v1611_v21  ;;  %1616 = vst [vmem:[%s372_s8 + $0x18] sm:$0xff] %v1612_v9  ;;  %v1626_v33 = vmul.f32 %v1621_v22, %v1612_v9 }
 0x5e6   : > { %v1627_v37 = vrot.slane %v1623_v23, 4  ;;  %v1633_v38 = vrot.slane %v1624_v27, 4  ;;  %v1639_v20 = vrot.slane %v1625_v29, 4 }
 0x5e7   : > { %v1645_v39 = vrot.slane %v1626_v33, 4  ;;  %v1655_v43 = vpop.permute.xlu1 %1654 }
 0x5e8   : > { %v1628_v40 = vadd.f32 %v1627_v37, %v1623_v23  ;;  %v1634_v41 = vadd.f32 %v1633_v38, %v1624_v27  ;;  %v1640_v42 = vadd.f32 %v1639_v20, %v1625_v29  ;;  %v1660_v25 = vrot.slane %v1655_v43, %v2035_v8 }
 0x5e9   : > { %v1646_v48 = vadd.f32 %v1645_v39, %v1626_v33 }
 0x5ea   : > { %v1629_v30 = vrot.slane %v1628_v40, 2  ;;  %v1635_v51 = vrot.slane %v1634_v41, 2  ;;  %v1641_v52 = vrot.slane %v1640_v42, 2 }
 0x5eb   : > { %v1647_v53 = vrot.slane %v1646_v48, 2 }
 0x5ec   : > { %v1630_v54 = vadd.f32 %v1629_v30, %v1628_v40  ;;  %v1636_v59 = vadd.f32 %v1635_v51, %v1634_v41  ;;  %v1642_v60 = vadd.f32 %v1641_v52, %v1640_v42 }
 0x5ed   : > { %v1648_v62 = vadd.f32 %v1647_v53, %v1646_v48 }
 0x5ee   : > { %v1631_v0 = vrot.slane %v1630_v54, 1  ;;  %v1637_v24 = vrot.slane %v1636_v59, 1  ;;  %v1643_v28 = vrot.slane %v1642_v60, 1 }
 0x5ef   : > { %v1649_v7 = vrot.slane %v1648_v62, 1 }
 0x5f0   : > { %v1632_v26 = vadd.f32 %v1631_v0, %v1630_v54  ;;  %v1638_v31 = vadd.f32 %v1637_v24, %v1636_v59  ;;  %v1644_v34 = vadd.f32 %v1643_v28, %v1642_v60 }
 0x5f1   : > { %v1650_v14 = vadd.f32 %v1649_v7, %v1648_v62 }
 0x5f2   : > { %v1661_v32 = vadd.f32 %v1660_v25, %v1632_v26  ;;  %v1662_v45 = vadd.f32 %v1660_v25, %v1638_v31  ;;  %v1663_v35 = vadd.f32 %v1660_v25, %v1644_v34 }
 0x5f3   : > { %v1664_v15 = vadd.f32 %v1660_v25, %v1650_v14 }
 0x5f4   : > { %v1669_v36 = vcombine.low %v1661_v32, %v1662_v45 }
 0x5f5   : > { %v1670_v46 = vcombine.low %v1663_v35, %v1664_v15 }
 0x5f6   : > { %v1677_v47 = vrot.slane %v1669_v36, %v1676_v44 }
 0x5f7   : > { %v1684_v55 = vrot.slane %v1670_v46, %v1676_v44 }
 0x5f9   : > { %v1685_v56 = vcombine.low %v1677_v47, %v1684_v55 }
 0x5fb   : > { %v1692_v8 = vrot.slane %v1685_v56, %v1676_v44 }
 0x5fd   : > { %1698 = vst.msk [vmem:[%s367_s22] sm:$0xf] %vm1696_vm5, %v1692_v8 }
 0x5fe PF: > { %s23_s15 = sadd.s32 1, %s1916_s15  }
 0x5ff   : > { %p20_p4 = scmp.ge.s32.totalorder %s23_s15, 4  }
 0x601   :  { %22 = sbr.rel (!%p20_p4) target bundleno = 3 (0x3), region = 99 }

</bundles_post_ra>
